<compile_context>
chip_gen: v7x
topology: tpu7x:2x2x1
jax: 0.10.0
libtpu: 0.0.40
codegen_flags: <defaults>
</compile_context>

<pallas_src>
import functools

import jax
import jax.numpy as jnp
from jax.experimental import pallas as pl
from jax.experimental.pallas import tpu as pltpu

_BN_EPS = 1e-3


def _round_up(x, m):
    return (x + m - 1) // m * m


# ---------------------------------------------------------------------------
# Fused tiled matmul: out = [relu]((A @ W) * scale + bias)
#   A:(M,K) bf16, W:(K,N) bf16, scale/bias:(1,N) f32, out:(M,N) f32
# ---------------------------------------------------------------------------
def _fused_matmul_kernel(a_ref, w_ref, scale_ref, bias_ref, o_ref, acc_ref, *, relu):
    @pl.when(pl.program_id(2) == 0)
    def _():
        acc_ref[...] = jnp.zeros_like(acc_ref)

    acc_ref[...] += jnp.dot(a_ref[...], w_ref[...],
                            preferred_element_type=jnp.float32)

    @pl.when(pl.program_id(2) == pl.num_programs(2) - 1)
    def _():
        r = acc_ref[...] * scale_ref[...] + bias_ref[...]
        if relu:
            r = jnp.maximum(r, 0.0)
        o_ref[...] = r.astype(o_ref.dtype)


def fused_matmul(a, w, scale=None, bias=None, *, relu=False,
                 tm=256, tn=256, tk=512):
    m, k = a.shape
    k2, n = w.shape
    assert k == k2, (a.shape, w.shape)
    if scale is None:
        scale = jnp.ones((1, n), jnp.float32)
    if bias is None:
        bias = jnp.zeros((1, n), jnp.float32)

    # Tile sizes respecting the (8, 128) layout; pad ragged dims so every
    # output store is lane-dense (e.g. num_classes=10 -> padded to 128).
    tm = min(tm, _round_up(m, 8))
    tn = min(tn, _round_up(n, 128))
    tk = min(tk, _round_up(k, 128))
    mp, np_, kp = _round_up(m, tm), _round_up(n, tn), _round_up(k, tk)

    a_p = jnp.pad(a, ((0, mp - m), (0, kp - k))).astype(jnp.bfloat16)
    w_p = jnp.pad(w, ((0, kp - k), (0, np_ - n))).astype(jnp.bfloat16)
    scale_p = jnp.pad(scale.astype(jnp.float32), ((0, 0), (0, np_ - n)),
                      constant_values=1.0)
    bias_p = jnp.pad(bias.astype(jnp.float32), ((0, 0), (0, np_ - n)))

    grid = (mp // tm, np_ // tn, kp // tk)
    cost = pl.CostEstimate(
        flops=2 * mp * np_ * kp,
        transcendentals=0,
        bytes_accessed=mp * kp * 2 + kp * np_ * 2 + mp * np_ * 4 + 2 * np_ * 4,
    )
    out = pl.pallas_call(
        functools.partial(_fused_matmul_kernel, relu=relu),
        out_shape=jax.ShapeDtypeStruct((mp, np_), jnp.float32),
        grid_spec=pltpu.PrefetchScalarGridSpec(
            num_scalar_prefetch=0,
            grid=grid,
            in_specs=[
                pl.BlockSpec((tm, tk), lambda i, j, kk: (i, kk)),
                pl.BlockSpec((tk, tn), lambda i, j, kk: (kk, j)),
                pl.BlockSpec((1, tn), lambda i, j, kk: (0, j)),
                pl.BlockSpec((1, tn), lambda i, j, kk: (0, j)),
            ],
            out_specs=pl.BlockSpec((tm, tn), lambda i, j, kk: (i, j)),
            scratch_shapes=[pltpu.VMEM((tm, tn), jnp.float32)],
        ),
        compiler_params=pltpu.CompilerParams(
            dimension_semantics=("parallel", "parallel", "arbitrary")),
        cost_estimate=cost,
    )(a_p, w_p, scale_p, bias_p)
    return out[:m, :n]


# ---------------------------------------------------------------------------
# Adaptive average pooling to a 4x4 spatial grid (F.adaptive_avg_pool2d).
# One kernel invocation per batch element; each input element is read once.
# ---------------------------------------------------------------------------
def _adaptive_bins(size, out_size):
    # PyTorch adaptive pooling bins: [floor(i*size/out), ceil((i+1)*size/out))
    return [(i * size // out_size, -((-(i + 1) * size) // out_size))
            for i in range(out_size)]


def _make_adaptive_pool_kernel(h_bins, w_bins):
    def kernel(x_ref, o_ref):
        x = x_ref[0]  # [H, W, C] f32, whole block already in VMEM
        rows = []
        for (h0, h1) in h_bins:
            for (w0, w1) in w_bins:
                win = x[h0:h1, w0:w1, :]                       # static slice
                col = jnp.sum(win, axis=0)                     # [ws, C]
                row = jnp.sum(col, axis=0, keepdims=True)      # [1, C]
                rows.append(row * (1.0 / float((h1 - h0) * (w1 - w0))))
        o_ref[0] = jnp.concatenate(rows, axis=0)               # [16, C]
    return kernel


def adaptive_avg_pool_4x4(x_nhwc):
    n, h, w, c = x_nhwc.shape
    h_bins = _adaptive_bins(h, 4)
    w_bins = _adaptive_bins(w, 4)
    return pl.pallas_call(
        _make_adaptive_pool_kernel(h_bins, w_bins),
        out_shape=jax.ShapeDtypeStruct((n, 16, c), jnp.float32),
        grid_spec=pltpu.PrefetchScalarGridSpec(
            num_scalar_prefetch=0,
            grid=(n,),
            in_specs=[pl.BlockSpec((1, h, w, c), lambda i: (i, 0, 0, 0))],
            out_specs=pl.BlockSpec((1, 16, c), lambda i: (i, 0, 0)),
        ),
        compiler_params=pltpu.CompilerParams(dimension_semantics=("parallel",)),
    )(x_nhwc)


# ---------------------------------------------------------------------------
# Parameter init (deterministic, synthetic) and forward pass
# ---------------------------------------------------------------------------
def init_inception_aux(key, in_channel, num_classes):
    k_conv, k_fc1w, k_fc1b, k_fc2w, k_fc2b = jax.random.split(key, 5)

    # BasicConv2d(in_channel, 128, kernel_size=1): 1x1 conv (bias=False) + BN
    conv_w = 0.01 * jax.random.truncated_normal(
        k_conv, -2.0, 2.0, (in_channel, 128), jnp.float32)
    # BN eval fold: gamma=1, beta=0, running_mean=0, running_var=1, eps=1e-3
    gamma = jnp.ones((1, 128), jnp.float32)
    beta = jnp.zeros((1, 128), jnp.float32)
    running_mean = jnp.zeros((1, 128), jnp.float32)
    running_var = jnp.ones((1, 128), jnp.float32)
    bn_scale = gamma / jnp.sqrt(running_var + _BN_EPS)
    bn_bias = beta - running_mean * bn_scale

    def linear_init(kw, kb, fan_in, fan_out):
        bound = 1.0 / float(fan_in) ** 0.5
        return {
            "w": jax.random.uniform(kw, (fan_in, fan_out), jnp.float32, -bound, bound),
            "b": jax.random.uniform(kb, (1, fan_out), jnp.float32, -bound, bound),
        }

    return {
        "conv": {"w": conv_w, "scale": bn_scale, "bias": bn_bias},
        "fc1": linear_init(k_fc1w, k_fc1b, 2048, 1024),
        "fc2": linear_init(k_fc2w, k_fc2b, 1024, num_classes),
    }


def inception_aux_forward(params, x_nchw):
    """Eval-mode InceptionAux forward. x_nchw: [N, Cin, H, W] -> [N, num_classes]."""
    n = x_nchw.shape[0]
    x = jnp.transpose(x_nchw, (0, 2, 3, 1)).astype(jnp.float32)      # NHWC

    # F.adaptive_avg_pool2d(x, (4, 4))
    pooled = adaptive_avg_pool_4x4(x)                                # [N, 16, Cin]

    # BasicConv2d: 1x1 conv (== matmul) + folded BN + ReLU, fused in one kernel
    conv = params["conv"]
    y = fused_matmul(pooled.reshape(n * 16, -1), conv["w"],
                     conv["scale"], conv["bias"], relu=True)          # [N*16, 128]

    # torch.flatten(x, 1) on NCHW is channel-major: [N, 128, 4, 4] -> [N, 2048]
    y = jnp.transpose(y.reshape(n, 4, 4, 128), (0, 3, 1, 2)).reshape(n, 2048)

    # fc1 + ReLU
    y = fused_matmul(y, params["fc1"]["w"], bias=params["fc1"]["b"], relu=True)

    # F.dropout(p=0.7) is the identity in eval mode
    # TODO(synk): training-mode stochastic dropout not implemented.

    # fc2
    logits = fused_matmul(y, params["fc2"]["w"], bias=params["fc2"]["b"],
                          relu=False)
    return logits


if __name__ == "__main__":
    key = jax.random.PRNGKey(0)
    pkey, xkey = jax.random.split(key)

    in_channel, num_classes = 256, 10
    params = init_inception_aux(pkey, in_channel, num_classes)
    x = jax.random.normal(xkey, (2, in_channel, 8, 8), jnp.float32)   # NCHW like PyTorch

    fwd = jax.jit(functools.partial(inception_aux_forward, params))
    logits = fwd(x)
    jax.block_until_ready(logits)

    assert logits.shape == (2, num_classes), logits.shape
    assert bool(jnp.all(jnp.isfinite(logits)))
    print("KERNEL_OK")
</pallas_src>

<mosaic_0001>
module attributes {stable_mosaic.version = 11 : i64} {
  func.func @_fused_matmul_kernel(%arg0: i32, %arg1: i32, %arg2: i32, %arg3: memref<32x256xbf16, #tpu.memory_space<vmem>>, %arg4: memref<256x128xbf16, #tpu.memory_space<vmem>>, %arg5: memref<1x128xf32, #tpu.memory_space<vmem>>, %arg6: memref<1x128xf32, #tpu.memory_space<vmem>>, %arg7: memref<32x128xf32, #tpu.memory_space<vmem>>, %arg8: memref<32x128xf32, #tpu.memory_space<vmem>>) attributes {dimension_semantics = [#tpu.dimension_semantics<parallel>, #tpu.dimension_semantics<parallel>, #tpu.dimension_semantics<arbitrary>], iteration_bounds = array<i64: 1, 1, 1>, scalar_prefetch = 0 : i64, scratch_operands = 1 : i64, tpu.core_type = #tpu.core_type<tc>, window_params = [{transform_indices = @transform_0, window_bounds = array<i64: 32, 256>}, {transform_indices = @transform_1, window_bounds = array<i64: 256, 128>}, {transform_indices = @transform_2, window_bounds = array<i64: 1, 128>}, {transform_indices = @transform_3, window_bounds = array<i64: 1, 128>}, {transform_indices = @transform_4, window_bounds = array<i64: 32, 128>}]} {
    %c0_i32 = arith.constant 0 : i32
    %0 = arith.cmpi eq, %arg2, %c0_i32 : i32
    %1 = arith.extui %0 : i1 to i32
    %c0_i32_0 = arith.constant 0 : i32
    %2 = arith.cmpi ne, %1, %c0_i32_0 : i32
    scf.if %2 {
      %cst_10 = arith.constant 0.000000e+00 : f32
      %12 = vector.broadcast %cst_10 : f32 to vector<32x128xf32>
      %c0_11 = arith.constant 0 : index
      %c0_12 = arith.constant 0 : index
      %13 = vector.load %arg8[%c0_11, %c0_12] : memref<32x128xf32, #tpu.memory_space<vmem>>, vector<32x128xf32>
      tpu.vector_store %arg8[%c0_11, %c0_12], %12 {strides = array<i32>} : memref<32x128xf32, #tpu.memory_space<vmem>>, vector<32x128xf32>,
    } else {
    }
    %c0 = arith.constant 0 : index
    %c0_1 = arith.constant 0 : index
    %3 = vector.load %arg8[%c0, %c0_1] : memref<32x128xf32, #tpu.memory_space<vmem>>, vector<32x128xf32>
    %c0_2 = arith.constant 0 : index
    %c0_3 = arith.constant 0 : index
    %4 = vector.load %arg3[%c0_2, %c0_3] : memref<32x256xbf16, #tpu.memory_space<vmem>>, vector<32x256xbf16>
    %c0_4 = arith.constant 0 : index
    %c0_5 = arith.constant 0 : index
    %5 = vector.load %arg4[%c0_4, %c0_5] : memref<256x128xbf16, #tpu.memory_space<vmem>>, vector<256x128xbf16>
    %cst = arith.constant dense<0.000000e+00> : vector<32x128xf32>
    %6 = tpu.matmul %4, %5, %cst {dimension_numbers = #tpu.dot_dimension_numbers<[1], [0], [0], [1], [0, 0, 1, 1], [], []>} : vector<32x256xbf16>, vector<256x128xbf16>, vector<32x128xf32> -> vector<32x128xf32>
    %7 = arith.addf %3, %6 : vector<32x128xf32>
    %c0_6 = arith.constant 0 : index
    %c0_7 = arith.constant 0 : index
    %8 = vector.load %arg8[%c0_6, %c0_7] : memref<32x128xf32, #tpu.memory_space<vmem>>, vector<32x128xf32>
    tpu.vector_store %arg8[%c0_6, %c0_7], %7 {strides = array<i32>} : memref<32x128xf32, #tpu.memory_space<vmem>>, vector<32x128xf32>,
    %c0_i32_8 = arith.constant 0 : i32
    %9 = arith.cmpi eq, %arg2, %c0_i32_8 : i32
    %10 = arith.extui %9 : i1 to i32
    %c0_i32_9 = arith.constant 0 : i32
    %11 = arith.cmpi ne, %10, %c0_i32_9 : i32
    scf.if %11 {
      %c0_10 = arith.constant 0 : index
      %c0_11 = arith.constant 0 : index
      %12 = vector.load %arg8[%c0_10, %c0_11] : memref<32x128xf32, #tpu.memory_space<vmem>>, vector<32x128xf32>
      %c0_12 = arith.constant 0 : index
      %c0_13 = arith.constant 0 : index
      %13 = vector.load %arg5[%c0_12, %c0_13] : memref<1x128xf32, #tpu.memory_space<vmem>>, vector<1x128xf32>
      %14 = vector.broadcast %13 : vector<1x128xf32> to vector<32x128xf32>
      %15 = arith.mulf %12, %14 : vector<32x128xf32>
      %c0_14 = arith.constant 0 : index
      %c0_15 = arith.constant 0 : index
      %16 = vector.load %arg6[%c0_14, %c0_15] : memref<1x128xf32, #tpu.memory_space<vmem>>, vector<1x128xf32>
      %17 = vector.broadcast %16 : vector<1x128xf32> to vector<32x128xf32>
      %18 = arith.addf %15, %17 : vector<32x128xf32>
      %cst_16 = arith.constant 0.000000e+00 : f32
      %19 = vector.broadcast %cst_16 : f32 to vector<32x128xf32>
      %20 = arith.maximumf %18, %19 : vector<32x128xf32>
      %c0_17 = arith.constant 0 : index
      %c0_18 = arith.constant 0 : index
      %21 = vector.load %arg7[%c0_17, %c0_18] : memref<32x128xf32, #tpu.memory_space<vmem>>, vector<32x128xf32>
      tpu.vector_store %arg7[%c0_17, %c0_18], %20 {strides = array<i32>} : memref<32x128xf32, #tpu.memory_space<vmem>>, vector<32x128xf32>,
    } else {
    }
    return
  }
  func.func @transform_0(%arg0: i32, %arg1: i32, %arg2: i32) -> (i32, i32) {
    %c0_i32 = arith.constant 0 : i32
    return %arg0, %arg2 : i32, i32
  }
  func.func @transform_1(%arg0: i32, %arg1: i32, %arg2: i32) -> (i32, i32) {
    %c0_i32 = arith.constant 0 : i32
    return %arg2, %arg1 : i32, i32
  }
  func.func @transform_2(%arg0: i32, %arg1: i32, %arg2: i32) -> (i32, i32) {
    %c0_i32 = arith.constant 0 : i32
    %c0_i32_0 = arith.constant 0 : i32
    return %c0_i32, %arg1 : i32, i32
  }
  func.func @transform_3(%arg0: i32, %arg1: i32, %arg2: i32) -> (i32, i32) {
    %c0_i32 = arith.constant 0 : i32
    %c0_i32_0 = arith.constant 0 : i32
    return %c0_i32, %arg1 : i32, i32
  }
  func.func @transform_4(%arg0: i32, %arg1: i32, %arg2: i32) -> (i32, i32) {
    %c0_i32 = arith.constant 0 : i32
    return %arg0, %arg1 : i32, i32
  }
}

module attributes {stable_mosaic.version = 11 : i64} {
  func.func @kernel(%arg0: i32, %arg1: memref<1x8x8x256xf32, #tpu.memory_space<vmem>>, %arg2: memref<1x16x256xf32, #tpu.memory_space<vmem>>) attributes {dimension_semantics = [#tpu.dimension_semantics<parallel>], iteration_bounds = array<i64: 2>, scalar_prefetch = 0 : i64, scratch_operands = 0 : i64, tpu.core_type = #tpu.core_type<tc>, window_params = [{transform_indices = @transform_0, window_bounds = array<i64: 1, 8, 8, 256>}, {transform_indices = @transform_1, window_bounds = array<i64: 1, 16, 256>}]} {
    %c0 = arith.constant 0 : index
    %c0_0 = arith.constant 0 : index
    %c0_1 = arith.constant 0 : index
    %c0_2 = arith.constant 0 : index
    %0 = vector.load %arg1[%c0, %c0_0, %c0_1, %c0_2] : memref<1x8x8x256xf32, #tpu.memory_space<vmem>>, vector<1x8x8x256xf32>
    %1 = vector.shape_cast %0 : vector<1x8x8x256xf32> to vector<8x8x256xf32>
    %2 = vector.extract_strided_slice %1 {offsets = [0, 0, 0], sizes = [2, 2, 256], strides = [1, 1, 1]} : vector<8x8x256xf32> to vector<2x2x256xf32>
    %cst = arith.constant dense<0.000000e+00> : vector<2x256xf32>
    %3 = vector.multi_reduction <add>, %2, %cst [0] : vector<2x2x256xf32> to vector<2x256xf32>
    %cst_3 = arith.constant dense<0.000000e+00> : vector<256xf32>
    %4 = vector.multi_reduction <add>, %3, %cst_3 [0] : vector<2x256xf32> to vector<256xf32>
    %5 = vector.shape_cast %4 : vector<256xf32> to vector<1x256xf32>
    %cst_4 = arith.constant 2.500000e-01 : f32
    %6 = vector.broadcast %cst_4 : f32 to vector<1x256xf32>
    %7 = arith.mulf %5, %6 : vector<1x256xf32>
    %8 = vector.extract_strided_slice %1 {offsets = [0, 2, 0], sizes = [2, 2, 256], strides = [1, 1, 1]} : vector<8x8x256xf32> to vector<2x2x256xf32>
    %cst_5 = arith.constant dense<0.000000e+00> : vector<2x256xf32>
    %9 = vector.multi_reduction <add>, %8, %cst_5 [0] : vector<2x2x256xf32> to vector<2x256xf32>
    %cst_6 = arith.constant dense<0.000000e+00> : vector<256xf32>
    %10 = vector.multi_reduction <add>, %9, %cst_6 [0] : vector<2x256xf32> to vector<256xf32>
    %11 = vector.shape_cast %10 : vector<256xf32> to vector<1x256xf32>
    %cst_7 = arith.constant 2.500000e-01 : f32
    %12 = vector.broadcast %cst_7 : f32 to vector<1x256xf32>
    %13 = arith.mulf %11, %12 : vector<1x256xf32>
    %14 = vector.extract_strided_slice %1 {offsets = [0, 4, 0], sizes = [2, 2, 256], strides = [1, 1, 1]} : vector<8x8x256xf32> to vector<2x2x256xf32>
    %cst_8 = arith.constant dense<0.000000e+00> : vector<2x256xf32>
    %15 = vector.multi_reduction <add>, %14, %cst_8 [0] : vector<2x2x256xf32> to vector<2x256xf32>
    %cst_9 = arith.constant dense<0.000000e+00> : vector<256xf32>
    %16 = vector.multi_reduction <add>, %15, %cst_9 [0] : vector<2x256xf32> to vector<256xf32>
    %17 = vector.shape_cast %16 : vector<256xf32> to vector<1x256xf32>
    %cst_10 = arith.constant 2.500000e-01 : f32
    %18 = vector.broadcast %cst_10 : f32 to vector<1x256xf32>
    %19 = arith.mulf %17, %18 : vector<1x256xf32>
    %20 = vector.extract_strided_slice %1 {offsets = [0, 6, 0], sizes = [2, 2, 256], strides = [1, 1, 1]} : vector<8x8x256xf32> to vector<2x2x256xf32>
    %cst_11 = arith.constant dense<0.000000e+00> : vector<2x256xf32>
    %21 = vector.multi_reduction <add>, %20, %cst_11 [0] : vector<2x2x256xf32> to vector<2x256xf32>
    %cst_12 = arith.constant dense<0.000000e+00> : vector<256xf32>
    %22 = vector.multi_reduction <add>, %21, %cst_12 [0] : vector<2x256xf32> to vector<256xf32>
    %23 = vector.shape_cast %22 : vector<256xf32> to vector<1x256xf32>
    %cst_13 = arith.constant 2.500000e-01 : f32
    %24 = vector.broadcast %cst_13 : f32 to vector<1x256xf32>
    %25 = arith.mulf %23, %24 : vector<1x256xf32>
    %26 = vector.extract_strided_slice %1 {offsets = [2, 0, 0], sizes = [2, 2, 256], strides = [1, 1, 1]} : vector<8x8x256xf32> to vector<2x2x256xf32>
    %cst_14 = arith.constant dense<0.000000e+00> : vector<2x256xf32>
    %27 = vector.multi_reduction <add>, %26, %cst_14 [0] : vector<2x2x256xf32> to vector<2x256xf32>
    %cst_15 = arith.constant dense<0.000000e+00> : vector<256xf32>
    %28 = vector.multi_reduction <add>, %27, %cst_15 [0] : vector<2x256xf32> to vector<256xf32>
    %29 = vector.shape_cast %28 : vector<256xf32> to vector<1x256xf32>
    %cst_16 = arith.constant 2.500000e-01 : f32
    %30 = vector.broadcast %cst_16 : f32 to vector<1x256xf32>
    %31 = arith.mulf %29, %30 : vector<1x256xf32>
    %32 = vector.extract_strided_slice %1 {offsets = [2, 2, 0], sizes = [2, 2, 256], strides = [1, 1, 1]} : vector<8x8x256xf32> to vector<2x2x256xf32>
    %cst_17 = arith.constant dense<0.000000e+00> : vector<2x256xf32>
    %33 = vector.multi_reduction <add>, %32, %cst_17 [0] : vector<2x2x256xf32> to vector<2x256xf32>
    %cst_18 = arith.constant dense<0.000000e+00> : vector<256xf32>
    %34 = vector.multi_reduction <add>, %33, %cst_18 [0] : vector<2x256xf32> to vector<256xf32>
    %35 = vector.shape_cast %34 : vector<256xf32> to vector<1x256xf32>
    %cst_19 = arith.constant 2.500000e-01 : f32
    %36 = vector.broadcast %cst_19 : f32 to vector<1x256xf32>
    %37 = arith.mulf %35, %36 : vector<1x256xf32>
    %38 = vector.extract_strided_slice %1 {offsets = [2, 4, 0], sizes = [2, 2, 256], strides = [1, 1, 1]} : vector<8x8x256xf32> to vector<2x2x256xf32>
    %cst_20 = arith.constant dense<0.000000e+00> : vector<2x256xf32>
    %39 = vector.multi_reduction <add>, %38, %cst_20 [0] : vector<2x2x256xf32> to vector<2x256xf32>
    %cst_21 = arith.constant dense<0.000000e+00> : vector<256xf32>
    %40 = vector.multi_reduction <add>, %39, %cst_21 [0] : vector<2x256xf32> to vector<256xf32>
    %41 = vector.shape_cast %40 : vector<256xf32> to vector<1x256xf32>
    %cst_22 = arith.constant 2.500000e-01 : f32
    %42 = vector.broadcast %cst_22 : f32 to vector<1x256xf32>
    %43 = arith.mulf %41, %42 : vector<1x256xf32>
    %44 = vector.extract_strided_slice %1 {offsets = [2, 6, 0], sizes = [2, 2, 256], strides = [1, 1, 1]} : vector<8x8x256xf32> to vector<2x2x256xf32>
    %cst_23 = arith.constant dense<0.000000e+00> : vector<2x256xf32>
    %45 = vector.multi_reduction <add>, %44, %cst_23 [0] : vector<2x2x256xf32> to vector<2x256xf32>
    %cst_24 = arith.constant dense<0.000000e+00> : vector<256xf32>
    %46 = vector.multi_reduction <add>, %45, %cst_24 [0] : vector<2x256xf32> to vector<256xf32>
    %47 = vector.shape_cast %46 : vector<256xf32> to vector<1x256xf32>
    %cst_25 = arith.constant 2.500000e-01 : f32
    %48 = vector.broadcast %cst_25 : f32 to vector<1x256xf32>
    %49 = arith.mulf %47, %48 : vector<1x256xf32>
    %50 = vector.extract_strided_slice %1 {offsets = [4, 0, 0], sizes = [2, 2, 256], strides = [1, 1, 1]} : vector<8x8x256xf32> to vector<2x2x256xf32>
    %cst_26 = arith.constant dense<0.000000e+00> : vector<2x256xf32>
    %51 = vector.multi_reduction <add>, %50, %cst_26 [0] : vector<2x2x256xf32> to vector<2x256xf32>
    %cst_27 = arith.constant dense<0.000000e+00> : vector<256xf32>
    %52 = vector.multi_reduction <add>, %51, %cst_27 [0] : vector<2x256xf32> to vector<256xf32>
    %53 = vector.shape_cast %52 : vector<256xf32> to vector<1x256xf32>
    %cst_28 = arith.constant 2.500000e-01 : f32
    %54 = vector.broadcast %cst_28 : f32 to vector<1x256xf32>
    %55 = arith.mulf %53, %54 : vector<1x256xf32>
    %56 = vector.extract_strided_slice %1 {offsets = [4, 2, 0], sizes = [2, 2, 256], strides = [1, 1, 1]} : vector<8x8x256xf32> to vector<2x2x256xf32>
    %cst_29 = arith.constant dense<0.000000e+00> : vector<2x256xf32>
    %57 = vector.multi_reduction <add>, %56, %cst_29 [0] : vector<2x2x256xf32> to vector<2x256xf32>
    %cst_30 = arith.constant dense<0.000000e+00> : vector<256xf32>
    %58 = vector.multi_reduction <add>, %57, %cst_30 [0] : vector<2x256xf32> to vector<256xf32>
    %59 = vector.shape_cast %58 : vector<256xf32> to vector<1x256xf32>
    %cst_31 = arith.constant 2.500000e-01 : f32
    %60 = vector.broadcast %cst_31 : f32 to vector<1x256xf32>
    %61 = arith.mulf %59, %60 : vector<1x256xf32>
    %62 = vector.extract_strided_slice %1 {offsets = [4, 4, 0], sizes = [2, 2, 256], strides = [1, 1, 1]} : vector<8x8x256xf32> to vector<2x2x256xf32>
    %cst_32 = arith.constant dense<0.000000e+00> : vector<2x256xf32>
    %63 = vector.multi_reduction <add>, %62, %cst_32 [0] : vector<2x2x256xf32> to vector<2x256xf32>
    %cst_33 = arith.constant dense<0.000000e+00> : vector<256xf32>
    %64 = vector.multi_reduction <add>, %63, %cst_33 [0] : vector<2x256xf32> to vector<256xf32>
    %65 = vector.shape_cast %64 : vector<256xf32> to vector<1x256xf32>
    %cst_34 = arith.constant 2.500000e-01 : f32
    %66 = vector.broadcast %cst_34 : f32 to vector<1x256xf32>
    %67 = arith.mulf %65, %66 : vector<1x256xf32>
    %68 = vector.extract_strided_slice %1 {offsets = [4, 6, 0], sizes = [2, 2, 256], strides = [1, 1, 1]} : vector<8x8x256xf32> to vector<2x2x256xf32>
    %cst_35 = arith.constant dense<0.000000e+00> : vector<2x256xf32>
    %69 = vector.multi_reduction <add>, %68, %cst_35 [0] : vector<2x2x256xf32> to vector<2x256xf32>
    %cst_36 = arith.constant dense<0.000000e+00> : vector<256xf32>
    %70 = vector.multi_reduction <add>, %69, %cst_36 [0] : vector<2x256xf32> to vector<256xf32>
    %71 = vector.shape_cast %70 : vector<256xf32> to vector<1x256xf32>
    %cst_37 = arith.constant 2.500000e-01 : f32
    %72 = vector.broadcast %cst_37 : f32 to vector<1x256xf32>
    %73 = arith.mulf %71, %72 : vector<1x256xf32>
    %74 = vector.extract_strided_slice %1 {offsets = [6, 0, 0], sizes = [2, 2, 256], strides = [1, 1, 1]} : vector<8x8x256xf32> to vector<2x2x256xf32>
    %cst_38 = arith.constant dense<0.000000e+00> : vector<2x256xf32>
    %75 = vector.multi_reduction <add>, %74, %cst_38 [0] : vector<2x2x256xf32> to vector<2x256xf32>
    %cst_39 = arith.constant dense<0.000000e+00> : vector<256xf32>
    %76 = vector.multi_reduction <add>, %75, %cst_39 [0] : vector<2x256xf32> to vector<256xf32>
    %77 = vector.shape_cast %76 : vector<256xf32> to vector<1x256xf32>
    %cst_40 = arith.constant 2.500000e-01 : f32
    %78 = vector.broadcast %cst_40 : f32 to vector<1x256xf32>
    %79 = arith.mulf %77, %78 : vector<1x256xf32>
    %80 = vector.extract_strided_slice %1 {offsets = [6, 2, 0], sizes = [2, 2, 256], strides = [1, 1, 1]} : vector<8x8x256xf32> to vector<2x2x256xf32>
    %cst_41 = arith.constant dense<0.000000e+00> : vector<2x256xf32>
    %81 = vector.multi_reduction <add>, %80, %cst_41 [0] : vector<2x2x256xf32> to vector<2x256xf32>
    %cst_42 = arith.constant dense<0.000000e+00> : vector<256xf32>
    %82 = vector.multi_reduction <add>, %81, %cst_42 [0] : vector<2x256xf32> to vector<256xf32>
    %83 = vector.shape_cast %82 : vector<256xf32> to vector<1x256xf32>
    %cst_43 = arith.constant 2.500000e-01 : f32
    %84 = vector.broadcast %cst_43 : f32 to vector<1x256xf32>
    %85 = arith.mulf %83, %84 : vector<1x256xf32>
    %86 = vector.extract_strided_slice %1 {offsets = [6, 4, 0], sizes = [2, 2, 256], strides = [1, 1, 1]} : vector<8x8x256xf32> to vector<2x2x256xf32>
    %cst_44 = arith.constant dense<0.000000e+00> : vector<2x256xf32>
    %87 = vector.multi_reduction <add>, %86, %cst_44 [0] : vector<2x2x256xf32> to vector<2x256xf32>
    %cst_45 = arith.constant dense<0.000000e+00> : vector<256xf32>
    %88 = vector.multi_reduction <add>, %87, %cst_45 [0] : vector<2x256xf32> to vector<256xf32>
    %89 = vector.shape_cast %88 : vector<256xf32> to vector<1x256xf32>
    %cst_46 = arith.constant 2.500000e-01 : f32
    %90 = vector.broadcast %cst_46 : f32 to vector<1x256xf32>
    %91 = arith.mulf %89, %90 : vector<1x256xf32>
    %92 = vector.extract_strided_slice %1 {offsets = [6, 6, 0], sizes = [2, 2, 256], strides = [1, 1, 1]} : vector<8x8x256xf32> to vector<2x2x256xf32>
    %cst_47 = arith.constant dense<0.000000e+00> : vector<2x256xf32>
    %93 = vector.multi_reduction <add>, %92, %cst_47 [0] : vector<2x2x256xf32> to vector<2x256xf32>
    %cst_48 = arith.constant dense<0.000000e+00> : vector<256xf32>
    %94 = vector.multi_reduction <add>, %93, %cst_48 [0] : vector<2x256xf32> to vector<256xf32>
    %95 = vector.shape_cast %94 : vector<256xf32> to vector<1x256xf32>
    %cst_49 = arith.constant 2.500000e-01 : f32
    %96 = vector.broadcast %cst_49 : f32 to vector<1x256xf32>
    %97 = arith.mulf %95, %96 : vector<1x256xf32>
    %98 = tpu.concatenate %7, %13, %19, %25, %31, %37, %43, %49, %55, %61, %67, %73, %79, %85, %91, %97 in 0 : vector<1x256xf32>, vector<1x256xf32>, vector<1x256xf32>, vector<1x256xf32>, vector<1x256xf32>, vector<1x256xf32>, vector<1x256xf32>, vector<1x256xf32>, vector<1x256xf32>, vector<1x256xf32>, vector<1x256xf32>, vector<1x256xf32>, vector<1x256xf32>, vector<1x256xf32>, vector<1x256xf32>, vector<1x256xf32> -> vector<16x256xf32>
    %c0_50 = arith.constant 0 : index
    %c0_51 = arith.constant 0 : index
    %c0_52 = arith.constant 0 : index
    %99 = vector.load %arg2[%c0_50, %c0_51, %c0_52] : memref<1x16x256xf32, #tpu.memory_space<vmem>>, vector<1x16x256xf32>
    %100 = vector.shape_cast %99 : vector<1x16x256xf32> to vector<16x256xf32>
    %101 = vector.shape_cast %98 : vector<16x256xf32> to vector<1x16x256xf32>
    tpu.vector_store %arg2[%c0_50, %c0_51, %c0_52], %101 {strides = array<i32>} : memref<1x16x256xf32, #tpu.memory_space<vmem>>, vector<1x16x256xf32>,
    return
  }
  func.func @transform_0(%arg0: i32) -> (i32, i32, i32, i32) {
    %c0_i32 = arith.constant 0 : i32
    %c0_i32_0 = arith.constant 0 : i32
    %c0_i32_1 = arith.constant 0 : i32
    %c0_i32_2 = arith.constant 0 : i32
    return %arg0, %c0_i32, %c0_i32_0, %c0_i32_1 : i32, i32, i32, i32
  }
  func.func @transform_1(%arg0: i32) -> (i32, i32, i32) {
    %c0_i32 = arith.constant 0 : i32
    %c0_i32_0 = arith.constant 0 : i32
    %c0_i32_1 = arith.constant 0 : i32
    return %arg0, %c0_i32, %c0_i32_0 : i32, i32, i32
  }
}

module attributes {stable_mosaic.version = 11 : i64} {
  func.func @_fused_matmul_kernel(%arg0: i32, %arg1: i32, %arg2: i32, %arg3: memref<8x512xbf16, #tpu.memory_space<vmem>>, %arg4: memref<512x256xbf16, #tpu.memory_space<vmem>>, %arg5: memref<1x256xf32, #tpu.memory_space<vmem>>, %arg6: memref<1x256xf32, #tpu.memory_space<vmem>>, %arg7: memref<8x256xf32, #tpu.memory_space<vmem>>, %arg8: memref<8x256xf32, #tpu.memory_space<vmem>>) attributes {dimension_semantics = [#tpu.dimension_semantics<parallel>, #tpu.dimension_semantics<parallel>, #tpu.dimension_semantics<arbitrary>], iteration_bounds = array<i64: 1, 4, 4>, scalar_prefetch = 0 : i64, scratch_operands = 1 : i64, tpu.core_type = #tpu.core_type<tc>, window_params = [{transform_indices = @transform_0, window_bounds = array<i64: 8, 512>}, {transform_indices = @transform_1, window_bounds = array<i64: 512, 256>}, {transform_indices = @transform_2, window_bounds = array<i64: 1, 256>}, {transform_indices = @transform_3, window_bounds = array<i64: 1, 256>}, {transform_indices = @transform_4, window_bounds = array<i64: 8, 256>}]} {
    %c0_i32 = arith.constant 0 : i32
    %0 = arith.cmpi eq, %arg2, %c0_i32 : i32
    %1 = arith.extui %0 : i1 to i32
    %c0_i32_0 = arith.constant 0 : i32
    %2 = arith.cmpi ne, %1, %c0_i32_0 : i32
    scf.if %2 {
      %cst_9 = arith.constant 0.000000e+00 : f32
      %12 = vector.broadcast %cst_9 : f32 to vector<8x256xf32>
      %c0_10 = arith.constant 0 : index
      %c0_11 = arith.constant 0 : index
      %13 = vector.load %arg8[%c0_10, %c0_11] : memref<8x256xf32, #tpu.memory_space<vmem>>, vector<8x256xf32>
      tpu.vector_store %arg8[%c0_10, %c0_11], %12 {strides = array<i32>} : memref<8x256xf32, #tpu.memory_space<vmem>>, vector<8x256xf32>,
    } else {
    }
    %c0 = arith.constant 0 : index
    %c0_1 = arith.constant 0 : index
    %3 = vector.load %arg8[%c0, %c0_1] : memref<8x256xf32, #tpu.memory_space<vmem>>, vector<8x256xf32>
    %c0_2 = arith.constant 0 : index
    %c0_3 = arith.constant 0 : index
    %4 = vector.load %arg3[%c0_2, %c0_3] : memref<8x512xbf16, #tpu.memory_space<vmem>>, vector<8x512xbf16>
    %c0_4 = arith.constant 0 : index
    %c0_5 = arith.constant 0 : index
    %5 = vector.load %arg4[%c0_4, %c0_5] : memref<512x256xbf16, #tpu.memory_space<vmem>>, vector<512x256xbf16>
    %cst = arith.constant dense<0.000000e+00> : vector<8x256xf32>
    %6 = tpu.matmul %4, %5, %cst {dimension_numbers = #tpu.dot_dimension_numbers<[1], [0], [0], [1], [0, 0, 1, 1], [], []>} : vector<8x512xbf16>, vector<512x256xbf16>, vector<8x256xf32> -> vector<8x256xf32>
    %7 = arith.addf %3, %6 : vector<8x256xf32>
    %c0_6 = arith.constant 0 : index
    %c0_7 = arith.constant 0 : index
    %8 = vector.load %arg8[%c0_6, %c0_7] : memref<8x256xf32, #tpu.memory_space<vmem>>, vector<8x256xf32>
    tpu.vector_store %arg8[%c0_6, %c0_7], %7 {strides = array<i32>} : memref<8x256xf32, #tpu.memory_space<vmem>>, vector<8x256xf32>,
    %c3_i32 = arith.constant 3 : i32
    %9 = arith.cmpi eq, %arg2, %c3_i32 : i32
    %10 = arith.extui %9 : i1 to i32
    %c0_i32_8 = arith.constant 0 : i32
    %11 = arith.cmpi ne, %10, %c0_i32_8 : i32
    scf.if %11 {
      %c0_9 = arith.constant 0 : index
      %c0_10 = arith.constant 0 : index
      %12 = vector.load %arg8[%c0_9, %c0_10] : memref<8x256xf32, #tpu.memory_space<vmem>>, vector<8x256xf32>
      %c0_11 = arith.constant 0 : index
      %c0_12 = arith.constant 0 : index
      %13 = vector.load %arg5[%c0_11, %c0_12] : memref<1x256xf32, #tpu.memory_space<vmem>>, vector<1x256xf32>
      %14 = vector.broadcast %13 : vector<1x256xf32> to vector<8x256xf32>
      %15 = arith.mulf %12, %14 : vector<8x256xf32>
      %c0_13 = arith.constant 0 : index
      %c0_14 = arith.constant 0 : index
      %16 = vector.load %arg6[%c0_13, %c0_14] : memref<1x256xf32, #tpu.memory_space<vmem>>, vector<1x256xf32>
      %17 = vector.broadcast %16 : vector<1x256xf32> to vector<8x256xf32>
      %18 = arith.addf %15, %17 : vector<8x256xf32>
      %cst_15 = arith.constant 0.000000e+00 : f32
      %19 = vector.broadcast %cst_15 : f32 to vector<8x256xf32>
      %20 = arith.maximumf %18, %19 : vector<8x256xf32>
      %c0_16 = arith.constant 0 : index
      %c0_17 = arith.constant 0 : index
      %21 = vector.load %arg7[%c0_16, %c0_17] : memref<8x256xf32, #tpu.memory_space<vmem>>, vector<8x256xf32>
      tpu.vector_store %arg7[%c0_16, %c0_17], %20 {strides = array<i32>} : memref<8x256xf32, #tpu.memory_space<vmem>>, vector<8x256xf32>,
    } else {
    }
    return
  }
  func.func @transform_0(%arg0: i32, %arg1: i32, %arg2: i32) -> (i32, i32) {
    %c0_i32 = arith.constant 0 : i32
    return %arg0, %arg2 : i32, i32
  }
  func.func @transform_1(%arg0: i32, %arg1: i32, %arg2: i32) -> (i32, i32) {
    %c0_i32 = arith.constant 0 : i32
    return %arg2, %arg1 : i32, i32
  }
  func.func @transform_2(%arg0: i32, %arg1: i32, %arg2: i32) -> (i32, i32) {
    %c0_i32 = arith.constant 0 : i32
    %c0_i32_0 = arith.constant 0 : i32
    return %c0_i32, %arg1 : i32, i32
  }
  func.func @transform_3(%arg0: i32, %arg1: i32, %arg2: i32) -> (i32, i32) {
    %c0_i32 = arith.constant 0 : i32
    %c0_i32_0 = arith.constant 0 : i32
    return %c0_i32, %arg1 : i32, i32
  }
  func.func @transform_4(%arg0: i32, %arg1: i32, %arg2: i32) -> (i32, i32) {
    %c0_i32 = arith.constant 0 : i32
    return %arg0, %arg1 : i32, i32
  }
}

module attributes {stable_mosaic.version = 11 : i64} {
  func.func @_fused_matmul_kernel(%arg0: i32, %arg1: i32, %arg2: i32, %arg3: memref<8x512xbf16, #tpu.memory_space<vmem>>, %arg4: memref<512x128xbf16, #tpu.memory_space<vmem>>, %arg5: memref<1x128xf32, #tpu.memory_space<vmem>>, %arg6: memref<1x128xf32, #tpu.memory_space<vmem>>, %arg7: memref<8x128xf32, #tpu.memory_space<vmem>>, %arg8: memref<8x128xf32, #tpu.memory_space<vmem>>) attributes {dimension_semantics = [#tpu.dimension_semantics<parallel>, #tpu.dimension_semantics<parallel>, #tpu.dimension_semantics<arbitrary>], iteration_bounds = array<i64: 1, 1, 2>, scalar_prefetch = 0 : i64, scratch_operands = 1 : i64, tpu.core_type = #tpu.core_type<tc>, window_params = [{transform_indices = @transform_0, window_bounds = array<i64: 8, 512>}, {transform_indices = @transform_1, window_bounds = array<i64: 512, 128>}, {transform_indices = @transform_2, window_bounds = array<i64: 1, 128>}, {transform_indices = @transform_3, window_bounds = array<i64: 1, 128>}, {transform_indices = @transform_4, window_bounds = array<i64: 8, 128>}]} {
    %c0_i32 = arith.constant 0 : i32
    %0 = arith.cmpi eq, %arg2, %c0_i32 : i32
    %1 = arith.extui %0 : i1 to i32
    %c0_i32_0 = arith.constant 0 : i32
    %2 = arith.cmpi ne, %1, %c0_i32_0 : i32
    scf.if %2 {
      %cst_9 = arith.constant 0.000000e+00 : f32
      %12 = vector.broadcast %cst_9 : f32 to vector<8x128xf32>
      %c0_10 = arith.constant 0 : index
      %c0_11 = arith.constant 0 : index
      %13 = vector.load %arg8[%c0_10, %c0_11] : memref<8x128xf32, #tpu.memory_space<vmem>>, vector<8x128xf32>
      tpu.vector_store %arg8[%c0_10, %c0_11], %12 {strides = array<i32>} : memref<8x128xf32, #tpu.memory_space<vmem>>, vector<8x128xf32>,
    } else {
    }
    %c0 = arith.constant 0 : index
    %c0_1 = arith.constant 0 : index
    %3 = vector.load %arg8[%c0, %c0_1] : memref<8x128xf32, #tpu.memory_space<vmem>>, vector<8x128xf32>
    %c0_2 = arith.constant 0 : index
    %c0_3 = arith.constant 0 : index
    %4 = vector.load %arg3[%c0_2, %c0_3] : memref<8x512xbf16, #tpu.memory_space<vmem>>, vector<8x512xbf16>
    %c0_4 = arith.constant 0 : index
    %c0_5 = arith.constant 0 : index
    %5 = vector.load %arg4[%c0_4, %c0_5] : memref<512x128xbf16, #tpu.memory_space<vmem>>, vector<512x128xbf16>
    %cst = arith.constant dense<0.000000e+00> : vector<8x128xf32>
    %6 = tpu.matmul %4, %5, %cst {dimension_numbers = #tpu.dot_dimension_numbers<[1], [0], [0], [1], [0, 0, 1, 1], [], []>} : vector<8x512xbf16>, vector<512x128xbf16>, vector<8x128xf32> -> vector<8x128xf32>
    %7 = arith.addf %3, %6 : vector<8x128xf32>
    %c0_6 = arith.constant 0 : index
    %c0_7 = arith.constant 0 : index
    %8 = vector.load %arg8[%c0_6, %c0_7] : memref<8x128xf32, #tpu.memory_space<vmem>>, vector<8x128xf32>
    tpu.vector_store %arg8[%c0_6, %c0_7], %7 {strides = array<i32>} : memref<8x128xf32, #tpu.memory_space<vmem>>, vector<8x128xf32>,
    %c1_i32 = arith.constant 1 : i32
    %9 = arith.cmpi eq, %arg2, %c1_i32 : i32
    %10 = arith.extui %9 : i1 to i32
    %c0_i32_8 = arith.constant 0 : i32
    %11 = arith.cmpi ne, %10, %c0_i32_8 : i32
    scf.if %11 {
      %c0_9 = arith.constant 0 : index
      %c0_10 = arith.constant 0 : index
      %12 = vector.load %arg8[%c0_9, %c0_10] : memref<8x128xf32, #tpu.memory_space<vmem>>, vector<8x128xf32>
      %c0_11 = arith.constant 0 : index
      %c0_12 = arith.constant 0 : index
      %13 = vector.load %arg5[%c0_11, %c0_12] : memref<1x128xf32, #tpu.memory_space<vmem>>, vector<1x128xf32>
      %14 = vector.broadcast %13 : vector<1x128xf32> to vector<8x128xf32>
      %15 = arith.mulf %12, %14 : vector<8x128xf32>
      %c0_13 = arith.constant 0 : index
      %c0_14 = arith.constant 0 : index
      %16 = vector.load %arg6[%c0_13, %c0_14] : memref<1x128xf32, #tpu.memory_space<vmem>>, vector<1x128xf32>
      %17 = vector.broadcast %16 : vector<1x128xf32> to vector<8x128xf32>
      %18 = arith.addf %15, %17 : vector<8x128xf32>
      %c0_15 = arith.constant 0 : index
      %c0_16 = arith.constant 0 : index
      %19 = vector.load %arg7[%c0_15, %c0_16] : memref<8x128xf32, #tpu.memory_space<vmem>>, vector<8x128xf32>
      tpu.vector_store %arg7[%c0_15, %c0_16], %18 {strides = array<i32>} : memref<8x128xf32, #tpu.memory_space<vmem>>, vector<8x128xf32>,
    } else {
    }
    return
  }
  func.func @transform_0(%arg0: i32, %arg1: i32, %arg2: i32) -> (i32, i32) {
    %c0_i32 = arith.constant 0 : i32
    return %arg0, %arg2 : i32, i32
  }
  func.func @transform_1(%arg0: i32, %arg1: i32, %arg2: i32) -> (i32, i32) {
    %c0_i32 = arith.constant 0 : i32
    return %arg2, %arg1 : i32, i32
  }
  func.func @transform_2(%arg0: i32, %arg1: i32, %arg2: i32) -> (i32, i32) {
    %c0_i32 = arith.constant 0 : i32
    %c0_i32_0 = arith.constant 0 : i32
    return %c0_i32, %arg1 : i32, i32
  }
  func.func @transform_3(%arg0: i32, %arg1: i32, %arg2: i32) -> (i32, i32) {
    %c0_i32 = arith.constant 0 : i32
    %c0_i32_0 = arith.constant 0 : i32
    return %c0_i32, %arg1 : i32, i32
  }
  func.func @transform_4(%arg0: i32, %arg1: i32, %arg2: i32) -> (i32, i32) {
    %c0_i32 = arith.constant 0 : i32
    return %arg0, %arg1 : i32, i32
  }
}

</mosaic_0001>

<bundles_post_ra>
// kernel: inception_aux_forward.5
= control target key start
LH: loop header
LB: loop body
LE: loop exit
PB: predicated region body
PF: predicated region fallthrough
CT: control target
= control target key end

     0   :  { %9 = vsyncpa [#allocation4], 0  ;;  %s410_s15 = smov [#allocation3]   ;;  %s480_s0 = inlined_call_operand.vmem [shape: bf16[32,256], index: 0, kind: input, shape index: {}]   ;;  %s481_s1 = inlined_call_operand.hbm [shape: bf16[256,128], index: 1, kind: input, shape index: {}]   ;;  %s482_s2 = inlined_call_operand.vmem [shape: f32[1,128], index: 2, kind: input, shape index: {}]   ;;  %s483_s3 = inlined_call_operand.vmem [shape: f32[1,128], index: 3, kind: input, shape index: {}]   ;;  %s484_s4 = inlined_call_operand.vmem [shape: f32[32,128], index: 4, kind: output, shape index: {}]  }
   0x1   :  { %s17_s16 = sshll.u32 %s410_s15, 4  ;;  %s386_s19 = scalar_lea.hbm %s481_s1, 2048  ;;  %s18_s16 = int_to_ptr.vmem [resolvable:$true] %s17_s16 }
   0x2   :  { %p387_p0 = scmp.ne.s32.totalorder %s481_s1, %s386_s19  ;;  %p390_p1 = scmp.lt.u32.totalorder %s386_s19, %s481_s1 }
   0x4   :  { %p392_p2 = pnand %p390_p1, %p387_p0 }
   0x6   :  { %395 = shalt.err (!%p392_p2)
}
   0x7   :  { %s396_s24 = scalar_lea.vmem %s18_s16, 2048  ;;  %p401_p4 = scmp.lt.s32.totalorder %s18_s16, %s18_s16 }
   0x8   :  { %p397_p3 = scmp.ne.s32.totalorder %s18_s16, %s396_s24  ;;  %p402_p5 = scmp.lt.s32.totalorder %s396_s24, %s396_s24 }
   0xa   :  { %p403_p6 = por %p402_p5, %p401_p4 }
   0xc   :  { %p404_p7 = pnand %p403_p6, %p397_p3 }
   0xe   :  { %407 = shalt.err (!%p404_p7)
}
   0xf   :  { %s411_s25 = smov 64   ;;  %s412_s26 = smov 4  }
  0x10   :  { %23 = dma.hbm_to_vmem [thread:$0]  %s481_s1, 2048, %s18_s16, [#allocation4], %s411_s25, %s411_s25, %s412_s26  }
  0x11   :  { %408 = dma.done.wait [#allocation4], 2048  }
  0x12   :  { %409 = vsyncadd [#allocation4], 4294965248  ;;  %v364_v0 = vld [vmem:[#allocation3 + $0x40] sm:$0xff]   ;;  %v366_v2 = vld [vmem:[#allocation3 + $0x48] sm:$0xff]  }
  0x13   :  { %v365_v1 = vld [vmem:[#allocation3] sm:$0xff]   ;;  %317 = vmatprep.subr.bf16.mxu0 %v364_v0  ;;  %345 = vmatprep.subr.bf16.mxu1 %v364_v0  ;;  %v367_v3 = vld [vmem:[#allocation3 + $0x8] sm:$0xff]   ;;  %v368_v4 = vld [vmem:[#allocation3 + $0x50] sm:$0xff]  }
  0x14   :  { %318 = vmatpush3.bf16.msra.mxu0 %v365_v1  ;;  %353 = vmatpush3.bf16.msra.mxu1 %v365_v1  ;;  %v369_v5 = vld [vmem:[#allocation3 + $0x10] sm:$0xff]   ;;  %v370_v6 = vld [vmem:[#allocation3 + $0x58] sm:$0xff]   ;;  %v372_v8 = vld [vmem:[#allocation3 + $0x60] sm:$0xff]  }
  0x15   :  { %319 = vmatprep.subr.bf16.mxu0 %v366_v2  ;;  %346 = vmatprep.subr.bf16.mxu1 %v366_v2  ;;  %v371_v7 = vld [vmem:[#allocation3 + $0x18] sm:$0xff]   ;;  %v373_v9 = vld [vmem:[#allocation3 + $0x20] sm:$0xff]   ;;  %v374_v10 = vld [vmem:[#allocation3 + $0x68] sm:$0xff]  }
  0x16   :  { %v382_v11 = vld [vmem:[%s480_s0 + $0x4] ss:$8 sps:$4 sm:$0xff]   ;;  %v385_v12 = vld [vmem:[%s480_s0 + $0x14] ss:$8 sps:$4 sm:$0xff]   ;;  %v380_v18 = vld [vmem:[%s480_s0] ss:$8 sps:$4 sm:$0xff]  }
  0x17   :  { %v375_v13 = vld [vmem:[#allocation3 + $0x28] sm:$0xff]   ;;  %v376_v14 = vld [vmem:[#allocation3 + $0x70] sm:$0xff]   ;;  %228 = vmatprep.mubr.bf16.mxu0 %v382_v11  ;;  %236 = vmatprep.mubr.bf16.mxu1 %v385_v12  ;;  %v378_v16 = vld [vmem:[#allocation3 + $0x78] sm:$0xff]  }
  0x18   :  { %320 = vmatpush3.bf16.msra.mxu0 %v367_v3  ;;  %354 = vmatpush3.bf16.msra.mxu1 %v367_v3  ;;  %v377_v15 = vld [vmem:[#allocation3 + $0x30] sm:$0xff]   ;;  %v379_v17 = vld [vmem:[#allocation3 + $0x38] sm:$0xff]   ;;  %v315_v23 = vld [vmem:[%s482_s2] ss:$0 sm:$0xff] }
  0x19   :  { %321 = vmatprep.subr.bf16.mxu0 %v368_v4  ;;  %347 = vmatprep.subr.bf16.mxu1 %v368_v4  ;;  %v383_v19 = vld [vmem:[%s480_s0 + $0x10] ss:$8 sps:$4 sm:$0xff]   ;;  %v316_v29 = vld [vmem:[%s483_s3] ss:$0 sm:$0xff] }
  0x1c   :  { %322 = vmatpush3.bf16.msra.mxu0 %v369_v5  ;;  %355 = vmatpush3.bf16.msra.mxu1 %v369_v5 }
  0x1d   :  { %323 = vmatprep.subr.bf16.mxu0 %v370_v6  ;;  %348 = vmatprep.subr.bf16.mxu1 %v370_v6 }
  0x20   :  { %324 = vmatpush3.bf16.msra.mxu0 %v371_v7  ;;  %356 = vmatpush3.bf16.msra.mxu1 %v371_v7 }
  0x21   :  { %325 = vmatprep.subr.bf16.mxu0 %v372_v8  ;;  %349 = vmatprep.subr.bf16.mxu1 %v372_v8 }
  0x24   :  { %326 = vmatpush3.bf16.msra.mxu0 %v373_v9  ;;  %357 = vmatpush3.bf16.msra.mxu1 %v373_v9 }
  0x25   :  { %327 = vmatprep.subr.bf16.mxu0 %v374_v10  ;;  %350 = vmatprep.subr.bf16.mxu1 %v374_v10 }
  0x28   :  { %328 = vmatpush3.bf16.msra.mxu0 %v375_v13  ;;  %358 = vmatpush3.bf16.msra.mxu1 %v375_v13 }
  0x29   :  { %329 = vmatprep.subr.bf16.mxu0 %v376_v14  ;;  %351 = vmatprep.subr.bf16.mxu1 %v376_v14 }
  0x2c   :  { %330 = vmatpush3.bf16.msra.mxu0 %v377_v15  ;;  %359 = vmatpush3.bf16.msra.mxu1 %v377_v15 }
  0x2d   :  { %331 = vmatprep.subr.bf16.mxu0 %v378_v16  ;;  %352 = vmatprep.subr.bf16.mxu1 %v378_v16 }
  0x30   :  { %332 = vmatpush3.bf16.msra.mxu0 %v379_v17  ;;  %360 = vmatpush3.bf16.msra.mxu1 %v379_v17 }
  0x33   :  { %229 = vmatmul.mubr.bf16.vlgmr.msra.gmra.mrb[0].mxu0 %v380_v18  ;;  %237 = vmatmul.mubr.bf16.vlgmr.msra.gmra.mrb[0].mxu1 %v383_v19 }
 0x106   :  { %v333_v20 = vpop.f32.mrb[0].mxu0  ;;  %v339_v21 = vpop.f32.mrb[0].mxu1 }
 0x107   :  { %v334_v22 = vpop.f32.mrb[1].mxu0  ;;  %v340_v24 = vpop.f32.mrb[1].mxu1 }
 0x108   :  { %v335_v25 = vadd.f32 %v334_v22, %v333_v20  ;;  %v341_v26 = vadd.f32 %v340_v24, %v339_v21  ;;  %v336_v27 = vpop.f32.mrb[2].mxu0  ;;  %v342_v28 = vpop.f32.mrb[2].mxu1 }
 0x109   :  { %v337_v30 = vpop.f32.mrb[3].mxu0  ;;  %v343_v31 = vpop.f32.mrb[3].mxu1 }
 0x10a   :  { %v267_v32 = vmul.f32 %v335_v25, %v315_v23  ;;  %v269_v33 = vmul.f32 %v341_v26, %v315_v23  ;;  %v338_v34 = vadd.f32 %v337_v30, %v336_v27  ;;  %v344_v35 = vadd.f32 %v343_v31, %v342_v28 }
 0x10c   :  { %v278_v36 = vadd.f32 %v316_v29, %v267_v32  ;;  %v280_v37 = vadd.f32 %v316_v29, %v269_v33  ;;  %v268_v38 = vmul.f32 %v338_v34, %v315_v23  ;;  %v270_v39 = vmul.f32 %v344_v35, %v315_v23 }
 0x10e   :  { %v282_v40 = vmax.f32 %v278_v36, 0.0  ;;  %v284_v41 = vmax.f32 %v280_v37, 0.0  ;;  %v279_v42 = vadd.f32 %v316_v29, %v268_v38  ;;  %v281_v43 = vadd.f32 %v316_v29, %v270_v39 }
 0x110   :  { %286 = vst [vmem:[%s484_s4] sm:$0xff] %v282_v40  ;;  %288 = vst [vmem:[%s484_s4 + $0x10] sm:$0xff] %v284_v41  ;;  %v283_v44 = vmax.f32 %v279_v42, 0.0  ;;  %v285_v45 = vmax.f32 %v281_v43, 0.0 }
 0x112   :  { %287 = vst [vmem:[%s484_s4 + $0x8] sm:$0xff] %v283_v44  ;;  %289 = vst [vmem:[%s484_s4 + $0x18] sm:$0xff] %v285_v45 }
 0x113   :  { %294 = vsyncpa [#allocation4], 1 }

// kernel: inception_aux_forward.4
= control target key start
LH: loop header
LB: loop body
LE: loop exit
PB: predicated region body
PF: predicated region fallthrough
CT: control target
= control target key end

     0   :  { %6 = vsyncpa [#allocation3], 0  ;;  %s1228_s0 = inlined_call_operand.hbm [shape: f32[2,8,8,256], index: 0, kind: input, shape index: {}]   ;;  %s1229_s1 = inlined_call_operand.vmem [shape: f32[2,16,256], index: 1, kind: output, shape index: {}]  }
   0x1   :  { %8 = vsyncpa [#allocation3 + $0x1], 0  ;;  %s820_s6 = smov 0   ;;  %s822_s7 = smov 0  }
   0x2   :  { %s824_s8 = smov 0   ;;  %s826_s9 = smov 0  }
   0x3 LB: > { %s839_s10 = sadd.s32 4294967295, %s805_s9   ;;  %s842_s11 = sadd.s32 1, %s805_s9   ;;  %s805_s9 = sphi %s826_s9, %s1236_s9   ;;  %s801_s8 = sphi %s824_s8, %s1235_s8   ;;  %s797_s7 = sphi %s822_s7, %s1234_s7   ;;  %s793_s6 = sphi %s820_s6, %s1233_s6  }
   0x4   : > { %s18_s12 = ssub.s32 %s805_s9, %s842_s11  ;;  %s21_s13 = sadd.s32 1, %s801_s8 }
   0x5   : > { %p19_p0 = scmp.eq.s32.totalorder %s18_s12, 0  ;;  %p28_p1 = scmp.ne.s32.totalorder %s801_s8, %s797_s7 }
   0x6   : > { %p29_p2 = scmp.eq.s32.totalorder %s805_s9, 0  ;;  %p34_p3 = scmp.ne.s32.totalorder %s797_s7, %s793_s6 }
   0x7   : > { %s852_s14 = scalar_select %p19_p0, %s801_s8, %s21_s13  }
   0x8   : > { %p30_p4 = por %p29_p2, %p28_p1  ;;  %p35_p5 = scmp.eq.s32.totalorder %s839_s10, 0 }
   0x9   : > { %p706_p6 = scmp.lt.s32.totalorder %s805_s9, 2  ;;  %s84_s16 = sand.u32 1, %s801_s8  }
   0xa   : > { %p856_p7 = por %p35_p5, %p34_p3  ;;  %s689_s17 = sshll.u32 %s84_s16, 7 }
   0xb   : > { %s698_s18 = sshll.u32 %s805_s9, 11  ;;  %s88_s22 = scalar_lea.vmem [#allocation2], %s689_s17 }
   0xc   : > { %s865_s21 = scalar_lea.hbm %s1228_s0, %s698_s18  ;;  %s95_s23 = sshll.u32 %s88_s22, 4  ;;  %s867_s23 = int_to_ptr.vmem [resolvable:$true] %s95_s23 }
   0xd   : > { %p869_p8 = pnand %p706_p6, %p30_p4  ;;  %s874_s25 = scalar_lea.sflag [#allocation3], %s84_s16 }
   0xe   : > { %s741_s26 = scalar_lea.hbm %s865_s21, 2048  ;;  %s746_s29 = scalar_lea.hbm %s1228_s0, 4096 }
   0xf   : > { %p742_p10 = scmp.ne.s32.totalorder %s865_s21, %s741_s26  ;;  %p743_p11 = pneg %p869_p8 }
  0x10   : > { %p747_p0 = scmp.lt.u32.totalorder %s865_s21, %s1228_s0  ;;  %p748_p1 = scmp.lt.u32.totalorder %s746_s29, %s741_s26 }
  0x11   : > { %p744_p12 = pnand %p743_p11, %p742_p10  ;;  %p750_p3 = scmp.lt.u32.totalorder %s741_s26, %s865_s21 }
  0x12   : > { %p749_p2 = por %p748_p1, %p747_p0 }
  0x13   : > { %p745_p13 = pneg %p744_p12 }
  0x14   : > { %p751_p4 = por %p750_p3, %p749_p2 }
  0x16   : > { %p752_p5 = pnand %p751_p4, %p745_p13 }
  0x18   : > { %755 = shalt.err (!%p752_p5)
}
  0x19   : > { %s756_s3 = scalar_lea.vmem %s867_s23, 2048  ;;  %s807_s4 = smov [#allocation2]  }
  0x1a   : > { %p757_p6 = scmp.ne.s32.totalorder %s867_s23, %s756_s3  ;;  %s761_s5 = sshll.u32 %s807_s4, 4  ;;  %s762_s5 = int_to_ptr.vmem [resolvable:$false] %s761_s5 }
  0x1b   : > { %s763_s6 = scalar_lea.vmem %s762_s5, 4096  ;;  %p764_p9 = scmp.lt.s32.totalorder %s867_s23, %s762_s5 }
  0x1c   : > { %p759_p10 = pnand %p757_p6, %p743_p11  ;;  %p765_p0 = scmp.lt.s32.totalorder %s763_s6, %s756_s3 }
  0x1e   : > { %p760_p12 = pneg %p759_p10  ;;  %p766_p1 = por %p765_p0, %p764_p9 }
  0x20   : > { %p767_p2 = pnand %p766_p1, %p760_p12 }
  0x22   : > { %770 = shalt.err (!%p767_p2)
}
  0x23   : > { %s808_s12 = smov 256   ;;  %s809_s13 = smov 16  }
  0x24   : > { %705 = dma.hbm_to_vmem [thread:$0]  (!%p869_p8), %s865_s21, 2048, %s867_s23, %s874_s25, %s808_s12, %s808_s12, %s809_s13  }
  0x25   : > { %p103_p11 = scmp.lt.s32.totalorder %s805_s9, 3  ;;  %p1232_p13 = scmp.ge.s32.totalorder %s805_s9, 1 }
  0x27   : > { %p104_p3 = pnand %p1232_p13, %p103_p11 }
  0x28   : > { %s109_s16 = sand.u32 (!%p104_p3), 1, %s797_s7  }
  0x29   : > { %107 = sbr.rel (%p104_p3) target bundleno = 158 (0x9e), region = 24  ;;  %s693_s17 = sshll.u32 (!%p104_p3), %s109_s16, 7 }
  0x2a   : > { %s110_s18 = scalar_lea.sflag (!%p104_p3), [#allocation3], %s109_s16  ;;  %s906_s19 = scalar_lea.vmem (!%p104_p3), [#allocation2], %s693_s17 }
  0x30   : > { %788 = dma.done.wait (%p856_p7), %s110_s18, 2048  }
  0x31   : > { %790 = vsyncadd (%p856_p7), %s110_s18, 4294965248  ;;  %vm153_vm0 = vcmask 1041408   ;;  %vm176_vm1 = vcmask 1043458   ;;  %v137_v0 = vld [vmem:[%s906_s19] sm:$0xff]  ;;  %v138_v1 = vld [vmem:[%s906_s19 + $0x8] sm:$0xff]  ;;  %vm205_vm2 = vcmask 1045508  }
  0x32   : > { %v139_v2 = vld [vmem:[%s906_s19 + $0x10] sm:$0xff]  ;;  %v140_v3 = vld [vmem:[%s906_s19 + $0x18] sm:$0xff]  ;;  %v154_v4 = vsel %vm153_vm0, %v137_v0, 0.0  ;;  %v157_v6 = vsel %vm153_vm0, %v138_v1, 0.0  ;;  %vm234_vm3 = vcmask 1047558   ;;  %v177_v9 = vsel %vm176_vm1, %v137_v0, 0.0 }
  0x33   : > { %v155_v5 = vsel %vm153_vm0, %v139_v2, 0.0  ;;  %v158_v8 = vsel %vm153_vm0, %v140_v3, 0.0  ;;  %v178_v10 = vsel %vm176_vm1, %v139_v2, 0.0  ;;  %v180_v13 = vsel %vm176_vm1, %v138_v1, 0.0  ;;  %v939_v63 = vld [vmem:[%s906_s19 + $0x20] sm:$0xff]  ;;  %p132_p7 = scmp.lt.s32.totalorder %s839_s10, 1 }
  0x34   : > { %v156_v7 = vadd.f32 %v155_v5, %v154_v4  ;;  %v159_v11 = vadd.f32 %v158_v8, %v157_v6  ;;  %v179_v12 = vadd.f32 %v178_v10, %v177_v9  ;;  %v181_v14 = vsel %vm176_vm1, %v140_v3, 0.0  ;;  %v946_v8 = vld [vmem:[%s906_s19 + $0x30] sm:$0xff] }
  0x35   : > { %v182_v16 = vadd.f32 %v181_v14, %v180_v13  ;;  %v206_v17 = vsel %vm205_vm2, %v137_v0, 0.0  ;;  %v207_v18 = vsel %vm205_vm2, %v139_v2, 0.0  ;;  %v209_v25 = vsel %vm205_vm2, %v138_v1, 0.0  ;;  %s1238_s10 = smov (!%p132_p7, %s839_s10), 1 }
  0x36   : > { %v160_v15 = vsel %vm153_vm0, %v156_v7, 0.0  ;;  %v167_v20 = vsel %vm153_vm0, %v159_v11, 0.0  ;;  %v185_v21 = vrot.slane %v179_v12, 2  ;;  %v208_v22 = vadd.f32 %v207_v18, %v206_v17  ;;  %v943_v7 = vld [vmem:[%s906_s19 + $0x28] sm:$0xff]  ;;  %v954_v17 = vld [vmem:[%s906_s19 + $0x38] sm:$0xff]  ;;  %s699_s9 = sshll.u32 %s1238_s10, 5 }
  0x37   : > { %v161_v19 = vrot.slane %v160_v15, 4  ;;  %v168_v23 = vrot.slane %v167_v20, 4  ;;  %v186_v24 = vrot.slane %v182_v16, 2  ;;  %v210_v26 = vsel %vm205_vm2, %v140_v3, 0.0  ;;  %s1176_s20 = scalar_lea.vmem %s1229_s1, %s699_s9 }
  0x38   : > { %v189_v28 = vsel %vm153_vm0, %v185_v21, 0.0  ;;  %v211_v29 = vadd.f32 %v210_v26, %v209_v25  ;;  %v214_v30 = vrot.slane %v208_v22, 4  ;;  %v235_v34 = vsel %vm234_vm3, %v137_v0, 0.0 }
  0x39   : > { %v162_v27 = vadd.f32 %v161_v19, %v160_v15  ;;  %v169_v31 = vadd.f32 %v168_v23, %v167_v20  ;;  %v190_v32 = vrot.slane %v189_v28, 4  ;;  %v196_v33 = vsel %vm153_vm0, %v186_v24, 0.0 }
  0x3a   : > { %v197_v36 = vrot.slane %v196_v33, 4  ;;  %v215_v37 = vrot.slane %v211_v29, 4  ;;  %v218_v38 = vsel %vm153_vm0, %v214_v30, 0.0  ;;  %v236_v42 = vsel %vm234_vm3, %v139_v2, 0.0 }
  0x3b   : > { %v163_v35 = vrot.slane %v162_v27, 2  ;;  %v170_v39 = vrot.slane %v169_v31, 2  ;;  %v191_v40 = vadd.f32 %v190_v32, %v189_v28  ;;  %v219_v41 = vrot.slane %v218_v38, 4 }
  0x3c   : > { %v198_v44 = vadd.f32 %v197_v36, %v196_v33  ;;  %v225_v45 = vsel %vm153_vm0, %v215_v37, 0.0  ;;  %v237_v46 = vadd.f32 %v236_v42, %v235_v34  ;;  %v238_v53 = vsel %vm234_vm3, %v138_v1, 0.0 }
  0x3d   : > { %v164_v43 = vadd.f32 %v163_v35, %v162_v27  ;;  %v171_v47 = vadd.f32 %v170_v39, %v169_v31  ;;  %v192_v48 = vrot.slane %v191_v40, 2  ;;  %v220_v49 = vadd.f32 %v219_v41, %v218_v38 }
  0x3e   : > { %v226_v50 = vrot.slane %v225_v45, 4  ;;  %v199_v52 = vrot.slane %v198_v44, 2  ;;  %v239_v54 = vsel %vm234_vm3, %v140_v3, 0.0  ;;  %v243_v62 = vrot.slane %v237_v46, 6 }
  0x3f   : > { %v165_v51 = vrot.slane %v164_v43, 1  ;;  %v172_v55 = vrot.slane %v171_v47, 1  ;;  %v193_v56 = vadd.f32 %v192_v48, %v191_v40  ;;  %v221_v57 = vrot.slane %v220_v49, 2 }
  0x40   : > { %v227_v58 = vadd.f32 %v226_v50, %v225_v45  ;;  %v200_v60 = vadd.f32 %v199_v52, %v198_v44  ;;  %v240_v61 = vadd.f32 %v239_v54, %v238_v53  ;;  %v247_v3 = vsel %vm153_vm0, %v243_v62, 0.0 }
  0x41   : > { %v166_v59 = vadd.f32 %v165_v51, %v164_v43  ;;  %v173_v0 = vadd.f32 %v172_v55, %v171_v47  ;;  %v194_v2 = vrot.slane %v193_v56, 1  ;;  %v222_v4 = vadd.f32 %v221_v57, %v220_v49 }
  0x42   : > { %v228_v5 = vrot.slane %v227_v58, 2  ;;  %v201_v1 = vrot.slane %v200_v60, 1  ;;  %v244_v6 = vrot.slane %v240_v61, 6  ;;  %v248_v14 = vrot.slane %v247_v3, 4 }
  0x43   : > { %v948_v9 = vmul.f32 0.25, %v166_v59  ;;  %v195_v10 = vadd.f32 %v194_v2, %v193_v56  ;;  %v223_v11 = vrot.slane %v222_v4, 1  ;;  %v263_v16 = vsel %vm153_vm0, %v939_v63, 0.0 }
  0x44   : > { %v229_v12 = vadd.f32 %v228_v5, %v227_v58  ;;  %v202_v13 = vadd.f32 %v201_v1, %v200_v60  ;;  %v254_v15 = vsel %vm153_vm0, %v244_v6, 0.0  ;;  %v956_v18 = vmul.f32 0.25, %v173_v0 }
  0x45   : > { %v224_v19 = vadd.f32 %v223_v11, %v222_v4  ;;  %v255_v21 = vrot.slane %v254_v15, 4  ;;  %v958_v22 = vmul.f32 0.25, %v195_v10  ;;  %v249_v23 = vadd.f32 %v248_v14, %v247_v3 }
  0x46   : > { %v230_v20 = vrot.slane %v229_v12, 1  ;;  %v264_v24 = vsel %vm153_vm0, %v946_v8, 0.0  ;;  %v266_v25 = vsel %vm153_vm0, %v943_v7, 0.0  ;;  %v964_v26 = vmul.f32 0.25, %v202_v13 }
  0x47   : > { %v256_v28 = vadd.f32 %v255_v21, %v254_v15  ;;  %v265_v29 = vadd.f32 %v264_v24, %v263_v16  ;;  %v250_v30 = vrot.slane %v249_v23, 2  ;;  %v267_v31 = vsel %vm153_vm0, %v954_v17, 0.0 }
  0x48   : > { %v231_v27 = vadd.f32 %v230_v20, %v229_v12  ;;  %v285_v32 = vsel %vm176_vm1, %v939_v63, 0.0  ;;  %v286_v33 = vsel %vm176_vm1, %v946_v8, 0.0  ;;  %v972_v34 = vmul.f32 0.25, %v224_v19 }
  0x49   : > { %v257_v35 = vrot.slane %v256_v28, 2  ;;  %v268_v36 = vadd.f32 %v267_v31, %v266_v25  ;;  %v269_v37 = vsel %vm153_vm0, %v265_v29, 0.0  ;;  %v251_v38 = vadd.f32 %v250_v30, %v249_v23 }
  0x4a   : > { %v270_v39 = vrot.slane %v269_v37, 4  ;;  %v287_v40 = vadd.f32 %v286_v33, %v285_v32  ;;  %v288_v41 = vsel %vm176_vm1, %v943_v7, 0.0  ;;  %v289_v44 = vsel %vm176_vm1, %v954_v17, 0.0 }
  0x4b   : > { %v258_v42 = vadd.f32 %v257_v35, %v256_v28  ;;  %v276_v43 = vsel %vm153_vm0, %v268_v36, 0.0  ;;  %v313_v45 = vsel %vm205_vm2, %v939_v63, 0.0  ;;  %v252_v46 = vrot.slane %v251_v38, 1 }
  0x4c   : > { %v271_v47 = vadd.f32 %v270_v39, %v269_v37  ;;  %v277_v48 = vrot.slane %v276_v43, 4  ;;  %v290_v49 = vadd.f32 %v289_v44, %v288_v41  ;;  %v293_v51 = vrot.slane %v287_v40, 2  ;;  %v1007_v37 = vld [vmem:[%s906_s19 + $0x40] sm:$0xff] }
  0x4d   : > { %v259_v50 = vrot.slane %v258_v42, 1  ;;  %v314_v52 = vsel %vm205_vm2, %v946_v8, 0.0  ;;  %v316_v53 = vsel %vm205_vm2, %v943_v7, 0.0  ;;  %v253_v54 = vadd.f32 %v252_v46, %v251_v38 }
  0x4e   : > { %v272_v55 = vrot.slane %v271_v47, 2  ;;  %v278_v56 = vadd.f32 %v277_v48, %v276_v43  ;;  %v294_v57 = vrot.slane %v290_v49, 2  ;;  %v986_v58 = vmul.f32 0.25, %v231_v27  ;;  %v1018_v49 = vld [vmem:[%s906_s19 + $0x48] sm:$0xff] }
  0x4f   : > { %v297_v59 = vsel %vm153_vm0, %v293_v51, 0.0  ;;  %v315_v60 = vadd.f32 %v314_v52, %v313_v45  ;;  %v317_v61 = vsel %vm205_vm2, %v954_v17, 0.0  ;;  %v260_v62 = vadd.f32 %v259_v50, %v258_v42  ;;  %v1015_v45 = vld [vmem:[%s906_s19 + $0x50] sm:$0xff] }
  0x50   : > { %v273_v0 = vadd.f32 %v272_v55, %v271_v47  ;;  %v279_v2 = vrot.slane %v278_v56, 2  ;;  %v298_v4 = vrot.slane %v297_v59, 4  ;;  %v991_v5 = vmul.f32 0.25, %v253_v54 }
  0x51   : > { %v304_v1 = vsel %vm153_vm0, %v294_v57, 0.0  ;;  %v318_v6 = vadd.f32 %v317_v61, %v316_v53  ;;  %v321_v3 = vrot.slane %v315_v60, 4  ;;  %v341_v16 = vsel %vm234_vm3, %v939_v63, 0.0 }
  0x52   : > { %v274_v10 = vrot.slane %v273_v0, 1  ;;  %v280_v11 = vadd.f32 %v279_v2, %v278_v56  ;;  %v299_v12 = vadd.f32 %v298_v4, %v297_v59  ;;  %v305_v13 = vrot.slane %v304_v1, 4  ;;  %v1028_v59 = vld [vmem:[%s906_s19 + $0x58] sm:$0xff] }
  0x53   : > { %v322_v14 = vrot.slane %v318_v6, 4  ;;  %v325_v15 = vsel %vm153_vm0, %v321_v3, 0.0  ;;  %v342_v19 = vsel %vm234_vm3, %v946_v8, 0.0  ;;  %v344_v29 = vsel %vm234_vm3, %v943_v7, 0.0 }
  0x54   : > { %v275_v20 = vadd.f32 %v274_v10, %v273_v0  ;;  %v281_v21 = vrot.slane %v280_v11, 1  ;;  %v300_v23 = vrot.slane %v299_v12, 2  ;;  %v306_v24 = vadd.f32 %v305_v13, %v304_v1 }
  0x55   : > { %v326_v25 = vrot.slane %v325_v15, 4  ;;  %v332_v27 = vsel %vm153_vm0, %v322_v14, 0.0  ;;  %v343_v28 = vadd.f32 %v342_v19, %v341_v16  ;;  %v1002_v30 = vmul.f32 0.25, %v260_v62 }
  0x56   : > { %v282_v31 = vadd.f32 %v281_v21, %v280_v11  ;;  %v301_v63 = vadd.f32 %v300_v23, %v299_v12  ;;  %v307_v32 = vrot.slane %v306_v24, 2  ;;  %v333_v8 = vrot.slane %v332_v27, 4 }
  0x57   : > { %v327_v33 = vadd.f32 %v326_v25, %v325_v15  ;;  %v345_v35 = vsel %vm234_vm3, %v954_v17, 0.0  ;;  %v349_v36 = vrot.slane %v343_v28, 6  ;;  %v1009_v38 = vmul.f32 0.25, %v275_v20 }
  0x58   : > { %v302_v39 = vrot.slane %v301_v63, 1  ;;  %v308_v40 = vadd.f32 %v307_v32, %v306_v24  ;;  %v346_v7 = vadd.f32 %v345_v35, %v344_v29  ;;  %v334_v42 = vadd.f32 %v333_v8, %v332_v27 }
  0x59   : > { %v328_v41 = vrot.slane %v327_v33, 2  ;;  %v353_v43 = vsel %vm153_vm0, %v349_v36, 0.0  ;;  %v369_v44 = vsel %vm153_vm0, %v1007_v37, 0.0  ;;  %v1020_v50 = vmul.f32 0.25, %v282_v31 }
  0x5a   : > { %v303_v17 = vadd.f32 %v302_v39, %v301_v63  ;;  %v309_v46 = vrot.slane %v308_v40, 1  ;;  %v350_v47 = vrot.slane %v346_v7, 6  ;;  %v354_v48 = vrot.slane %v353_v43, 4 }
  0x5b   : > { %v329_v51 = vadd.f32 %v328_v41, %v327_v33  ;;  %v335_v52 = vrot.slane %v334_v42, 2  ;;  %v370_v53 = vsel %vm153_vm0, %v1015_v45, 0.0  ;;  %v372_v57 = vsel %vm153_vm0, %v1018_v49, 0.0 }
  0x5c   : > { %v310_v54 = vadd.f32 %v309_v46, %v308_v40  ;;  %v355_v55 = vadd.f32 %v354_v48, %v353_v43  ;;  %v360_v56 = vsel %vm153_vm0, %v350_v47, 0.0  ;;  %v371_v0 = vadd.f32 %v370_v53, %v369_v44 }
  0x5d   : > { %v330_v60 = vrot.slane %v329_v51, 1  ;;  %v336_v61 = vadd.f32 %v335_v52, %v334_v42  ;;  %v361_v62 = vrot.slane %v360_v56, 4  ;;  %v1030_v2 = vmul.f32 0.25, %v303_v17 }
  0x5e   : > { %v356_v4 = vrot.slane %v355_v55, 2  ;;  %v373_v1 = vsel %vm153_vm0, %v1028_v59, 0.0  ;;  %v391_v6 = vsel %vm176_vm1, %v1007_v37, 0.0  ;;  %v1036_v13 = vmul.f32 0.25, %v310_v54 }
  0x5f   : > { %v331_v3 = vadd.f32 %v330_v60, %v329_v51  ;;  %v337_v10 = vrot.slane %v336_v61, 1  ;;  %v362_v11 = vadd.f32 %v361_v62, %v360_v56  ;;  %v374_v12 = vadd.f32 %v373_v1, %v372_v57 }
  0x60   : > { %v357_v14 = vadd.f32 %v356_v4, %v355_v55  ;;  %v375_v15 = vsel %vm153_vm0, %v371_v0, 0.0  ;;  %v392_v16 = vsel %vm176_vm1, %v1015_v45, 0.0  ;;  %v394_v23 = vsel %vm176_vm1, %v1018_v49, 0.0 }
  0x61   : > { %v338_v19 = vadd.f32 %v337_v10, %v336_v61  ;;  %v363_v20 = vrot.slane %v362_v11, 2  ;;  %v376_v21 = vrot.slane %v375_v15, 4  ;;  %v382_v25 = vsel %vm153_vm0, %v374_v12, 0.0 }
  0x62   : > { %v358_v24 = vrot.slane %v357_v14, 1  ;;  %v393_v27 = vadd.f32 %v392_v16, %v391_v6  ;;  %v395_v28 = vsel %vm176_vm1, %v1028_v59, 0.0  ;;  %v1046_v29 = vmul.f32 0.25, %v331_v3 }
  0x63   : > { %v364_v31 = vadd.f32 %v363_v20, %v362_v11  ;;  %v377_v63 = vadd.f32 %v376_v21, %v375_v15  ;;  %v383_v32 = vrot.slane %v382_v25, 4  ;;  %v396_v8 = vadd.f32 %v395_v28, %v394_v23 }
  0x64   : > { %v359_v33 = vadd.f32 %v358_v24, %v357_v14  ;;  %v399_v35 = vrot.slane %v393_v27, 2  ;;  %v419_v36 = vsel %vm205_vm2, %v1007_v37, 0.0  ;;  %v420_v41 = vsel %vm205_vm2, %v1015_v45, 0.0  ;;  %v1075_v24 = vld [vmem:[%s906_s19 + $0x70] sm:$0xff] }
  0x65   : > { %v365_v39 = vrot.slane %v364_v31, 1  ;;  %v378_v40 = vrot.slane %v377_v63, 2  ;;  %v384_v7 = vadd.f32 %v383_v32, %v382_v25  ;;  %v1052_v42 = vmul.f32 0.25, %v338_v19  ;;  %v1070_v19 = vld [vmem:[%s906_s19 + $0x60] sm:$0xff] }
  0x66   : > { %v400_v43 = vrot.slane %v396_v8, 2  ;;  %v403_v44 = vsel %vm153_vm0, %v399_v35, 0.0  ;;  %v421_v17 = vadd.f32 %v420_v41, %v419_v36  ;;  %v422_v53 = vsel %vm205_vm2, %v1018_v49, 0.0 }
  0x67   : > { %v366_v46 = vadd.f32 %v365_v39, %v364_v31  ;;  %v379_v47 = vadd.f32 %v378_v40, %v377_v63  ;;  %v385_v48 = vrot.slane %v384_v7, 2  ;;  %v404_v51 = vrot.slane %v403_v44, 4  ;;  %v1085_v39 = vld [vmem:[%s906_s19 + $0x68] sm:$0xff]  ;;  %v1088_v40 = vld [vmem:[%s906_s19 + $0x78] sm:$0xff] }
  0x68   : > { %v410_v52 = vsel %vm153_vm0, %v400_v43, 0.0  ;;  %v423_v54 = vsel %vm205_vm2, %v1028_v59, 0.0  ;;  %v427_v55 = vrot.slane %v421_v17, 4  ;;  %v1060_v56 = vmul.f32 0.25, %v359_v33 }
  0x69   : > { %v380_v57 = vrot.slane %v379_v47, 1  ;;  %v386_v60 = vadd.f32 %v385_v48, %v384_v7  ;;  %v405_v61 = vadd.f32 %v404_v51, %v403_v44  ;;  %v411_v62 = vrot.slane %v410_v52, 4 }
  0x6a   : > { %v424_v0 = vadd.f32 %v423_v54, %v422_v53  ;;  %v431_v4 = vsel %vm153_vm0, %v427_v55, 0.0  ;;  %v447_v1 = vsel %vm234_vm3, %v1007_v37, 0.0  ;;  %v1065_v12 = vmul.f32 0.25, %v366_v46 }
  0x6b   : > { %v381_v6 = vadd.f32 %v380_v57, %v379_v47  ;;  %v387_v3 = vrot.slane %v386_v60, 1  ;;  %v406_v10 = vrot.slane %v405_v61, 2  ;;  %v432_v11 = vrot.slane %v431_v4, 4 }
  0x6c   : > { %v412_v14 = vadd.f32 %v411_v62, %v410_v52  ;;  %v428_v15 = vrot.slane %v424_v0, 4  ;;  %v448_v16 = vsel %vm234_vm3, %v1015_v45, 0.0  ;;  %v450_v37 = vsel %vm234_vm3, %v1018_v49, 0.0 }
  0x6d   : > { %v388_v20 = vadd.f32 %v387_v3, %v386_v60  ;;  %v407_v21 = vadd.f32 %v406_v10, %v405_v61  ;;  %v433_v23 = vadd.f32 %v432_v11, %v431_v4  ;;  %v449_v28 = vadd.f32 %v448_v16, %v447_v1 }
  0x6e   : > { %v413_v25 = vrot.slane %v412_v14, 2  ;;  %v438_v27 = vsel %vm153_vm0, %v428_v15, 0.0  ;;  %v451_v31 = vsel %vm234_vm3, %v1028_v59, 0.0  ;;  %v1080_v45 = vmul.f32 0.25, %v381_v6 }
  0x6f   : > { %v408_v63 = vrot.slane %v407_v21, 1  ;;  %v434_v32 = vrot.slane %v433_v23, 2  ;;  %v439_v33 = vrot.slane %v438_v27, 4  ;;  %v452_v35 = vadd.f32 %v451_v31, %v450_v37 }
  0x70   : > { %v414_v8 = vadd.f32 %v413_v25, %v412_v14  ;;  %v455_v36 = vrot.slane %v449_v28, 6  ;;  %v475_v49 = vsel %vm153_vm0, %v1070_v19, 0.0  ;;  %v476_v59 = vsel %vm153_vm0, %v1075_v24, 0.0 }
  0x71   : > { %v409_v7 = vadd.f32 %v408_v63, %v407_v21  ;;  %v435_v41 = vadd.f32 %v434_v32, %v433_v23  ;;  %v440_v43 = vadd.f32 %v439_v33, %v438_v27  ;;  %v456_v17 = vrot.slane %v452_v35, 6 }
  0x72   : > { %v415_v44 = vrot.slane %v414_v8, 1  ;;  %v459_v46 = vsel %vm153_vm0, %v455_v36, 0.0  ;;  %v477_v47 = vadd.f32 %v476_v59, %v475_v49  ;;  %v1093_v48 = vmul.f32 0.25, %v388_v20 }
  0x73   : > { %v436_v51 = vrot.slane %v435_v41, 1  ;;  %v441_v52 = vrot.slane %v440_v43, 2  ;;  %v460_v53 = vrot.slane %v459_v46, 4  ;;  %v466_v55 = vsel %vm153_vm0, %v456_v17, 0.0 }
  0x74   : > { %v416_v54 = vadd.f32 %v415_v44, %v414_v8  ;;  %v478_v57 = vsel %vm153_vm0, %v1085_v39, 0.0  ;;  %v479_v60 = vsel %vm153_vm0, %v1088_v40, 0.0  ;;  %v1100_v61 = vmul.f32 0.25, %v409_v7 }
  0x75   : > { %v442_v62 = vadd.f32 %v441_v52, %v440_v43  ;;  %v461_v0 = vadd.f32 %v460_v53, %v459_v46  ;;  %v467_v4 = vrot.slane %v466_v55, 4  ;;  %v437_v6 = vadd.f32 %v436_v51, %v435_v41 }
  0x76   : > { %v1102_v1 = vmul.f32 0.25, %v416_v54  ;;  %v480_v3 = vadd.f32 %v479_v60, %v478_v57  ;;  %v481_v10 = vsel %vm153_vm0, %v477_v47, 0.0  ;;  %v497_v16 = vsel %vm176_vm1, %v1070_v19, 0.0 }
  0x77   : > { %v443_v11 = vrot.slane %v442_v62, 1  ;;  %v462_v14 = vrot.slane %v461_v0, 2  ;;  %v468_v15 = vadd.f32 %v467_v4, %v466_v55  ;;  %v482_v20 = vrot.slane %v481_v10, 4 }
  0x78   : > { %v488_v21 = vsel %vm153_vm0, %v480_v3, 0.0  ;;  %v498_v23 = vsel %vm176_vm1, %v1075_v24, 0.0  ;;  %v500_v37 = vsel %vm176_vm1, %v1085_v39, 0.0  ;;  %v501_v33 = vsel %vm176_vm1, %v1088_v40, 0.0 }
  0x79   : > { %v444_v25 = vadd.f32 %v443_v11, %v442_v62  ;;  %v463_v27 = vadd.f32 %v462_v14, %v461_v0  ;;  %v469_v28 = vrot.slane %v468_v15, 2  ;;  %v489_v31 = vrot.slane %v488_v21, 4 }
  0x7a   : > { %v483_v63 = vadd.f32 %v482_v20, %v481_v10  ;;  %v499_v32 = vadd.f32 %v498_v23, %v497_v16  ;;  %v525_v8 = vsel %vm205_vm2, %v1070_v19, 0.0  ;;  %v1116_v35 = vmul.f32 0.25, %v437_v6 }
  0x7b   : > { %v464_v36 = vrot.slane %v463_v27, 1  ;;  %v470_v49 = vadd.f32 %v469_v28, %v468_v15  ;;  %v490_v7 = vadd.f32 %v489_v31, %v488_v21  ;;  %vm581_vm4 = vcmask 1040384  }
  0x7c   : > { %v484_v41 = vrot.slane %v483_v63, 2  ;;  %v502_v43 = vadd.f32 %v501_v33, %v500_v37  ;;  %v505_v59 = vrot.slane %v499_v32, 2  ;;  %v526_v44 = vsel %vm205_vm2, %v1075_v24, 0.0 }
  0x7d   : > { %v465_v17 = vadd.f32 %v464_v36, %v463_v27  ;;  %v471_v46 = vrot.slane %v470_v49, 1  ;;  %v491_v47 = vrot.slane %v490_v7, 2  ;;  %v527_v51 = vadd.f32 %v526_v44, %v525_v8 }
  0x7e   : > { %v1120_v52 = vmul.f32 0.25, %v444_v25  ;;  %v485_v53 = vadd.f32 %v484_v41, %v483_v63  ;;  %v506_v54 = vrot.slane %v502_v43, 2  ;;  %v509_v55 = vsel %vm153_vm0, %v505_v59, 0.0 }
  0x7f   : > { %v472_v57 = vadd.f32 %v471_v46, %v470_v49  ;;  %v492_v60 = vadd.f32 %v491_v47, %v490_v7  ;;  %v510_v62 = vrot.slane %v509_v55, 4  ;;  %v528_v0 = vsel %vm205_vm2, %v1085_v39, 0.0 }
  0x80   : > { %vm586_vm5 = vcmask 1042432   ;;  %v486_v4 = vrot.slane %v485_v53, 1  ;;  %v516_v6 = vsel %vm153_vm0, %v506_v54, 0.0  ;;  %v529_v3 = vsel %vm205_vm2, %v1088_v40, 0.0 }
  0x81   : > { %v533_v10 = vrot.slane %v527_v51, 4  ;;  %v1128_v11 = vmul.f32 0.25, %v465_v17  ;;  %v493_v14 = vrot.slane %v492_v60, 1  ;;  %v511_v15 = vadd.f32 %v510_v62, %v509_v55 }
  0x82   : > { %v517_v16 = vrot.slane %v516_v6, 4  ;;  %vm589_vm6 = vcmask 1043456   ;;  %v1130_v20 = vmul.f32 0.25, %v472_v57  ;;  %v487_v21 = vadd.f32 %v486_v4, %v485_v53 }
  0x83   : > { %v530_v23 = vadd.f32 %v529_v3, %v528_v0  ;;  %v537_v37 = vsel %vm153_vm0, %v533_v10, 0.0  ;;  %v512_v25 = vrot.slane %v511_v15, 2  ;;  %v553_v31 = vsel %vm234_vm3, %v1070_v19, 0.0 }
  0x84   : > { %v518_v27 = vadd.f32 %v517_v16, %v516_v6  ;;  %v538_v28 = vrot.slane %v537_v37, 4  ;;  %vm592_vm7 = vcmask 1044480   ;;  %v494_v63 = vadd.f32 %v493_v14, %v492_v60 }
  0x85   : > { %v1136_v32 = vmul.f32 0.25, %v487_v21  ;;  %v534_v33 = vrot.slane %v530_v23, 4  ;;  %v554_v8 = vsel %vm234_vm3, %v1075_v24, 0.0  ;;  %v513_v36 = vadd.f32 %v512_v25, %v511_v15 }
  0x86   : > { %v519_v49 = vrot.slane %v518_v27, 2  ;;  %v539_v7 = vadd.f32 %v538_v28, %v537_v37  ;;  %v556_v41 = vsel %vm234_vm3, %v1085_v39, 0.0  ;;  %vm595_vm8 = vcmask 1045504  }
  0x87   : > { %v544_v19 = vsel %vm153_vm0, %v534_v33, 0.0  ;;  %v555_v43 = vadd.f32 %v554_v8, %v553_v31  ;;  %v557_v59 = vsel %vm234_vm3, %v1088_v40, 0.0  ;;  %v582_v44 = vsel %vm581_vm4, %v948_v9, %v958_v22 }
  0x88   : > { %vm598_vm9 = vcmask 1046528   ;;  %v514_v17 = vrot.slane %v513_v36, 1  ;;  %v520_v24 = vadd.f32 %v519_v49, %v518_v27  ;;  %v540_v46 = vrot.slane %v539_v7, 2 }
  0x89   : > { %v545_v47 = vrot.slane %v544_v19, 4  ;;  %v558_v39 = vadd.f32 %v557_v59, %v556_v41  ;;  %v561_v51 = vrot.slane %v555_v43, 6  ;;  %v583_v53 = vsel %vm581_vm4, %v956_v18, %v964_v26 }
  0x8a   : > { %v584_v40 = vsel %vm153_vm0, %v582_v44, %v972_v34  ;;  %v515_v54 = vadd.f32 %v514_v17, %v513_v36  ;;  %v521_v9 = vrot.slane %v520_v24, 1  ;;  %v541_v22 = vadd.f32 %v540_v46, %v539_v7 }
  0x8b   : > { %v546_v55 = vadd.f32 %v545_v47, %v544_v19  ;;  %v562_v57 = vrot.slane %v558_v39, 6  ;;  %v565_v60 = vsel %vm153_vm0, %v561_v51, 0.0  ;;  %v585_v62 = vsel %vm153_vm0, %v583_v53, %v986_v58 }
  0x8c   : > { %v587_v0 = vsel %vm586_vm5, %v584_v40, %v991_v5  ;;  %v496_v4 = vmul.f32 0.25, %v494_v63  ;;  %v522_v6 = vadd.f32 %v521_v9, %v520_v24  ;;  %v542_v3 = vrot.slane %v541_v22, 1 }
  0x8d   : > { %v547_v18 = vrot.slane %v546_v55, 2  ;;  %v566_v26 = vrot.slane %v565_v60, 4  ;;  %v572_v34 = vsel %vm153_vm0, %v562_v57, 0.0  ;;  %v588_v10 = vsel %vm586_vm5, %v585_v62, %v1002_v30 }
  0x8e   : > { %v590_v14 = vsel %vm589_vm6, %v587_v0, %v1009_v38  ;;  %v523_v15 = vmul.f32 0.25, %v515_v54  ;;  %v524_v16 = vmul.f32 0.25, %v522_v6  ;;  %v573_v21 = vrot.slane %v572_v34, 4 }
  0x8f   : > { %v548_v58 = vadd.f32 %v547_v18, %v546_v55  ;;  %v543_v23 = vadd.f32 %v542_v3, %v541_v22  ;;  %v567_v5 = vadd.f32 %v566_v26, %v565_v60  ;;  %v591_v37 = vsel %vm589_vm6, %v588_v10, %v1020_v50 }
  0x90   : > { %v593_v25 = vsel %vm592_vm7, %v590_v14, %v1030_v2  ;;  %v574_v38 = vadd.f32 %v573_v21, %v572_v34  ;;  %v594_v27 = vsel %vm592_vm7, %v591_v37, %v1036_v13  ;;  %v601_v28 = vsel %vm581_vm4, %v1080_v45, %v1100_v61 }
  0x91   : > { %v549_v30 = vrot.slane %v548_v58, 1  ;;  %v568_v50 = vrot.slane %v567_v5, 2  ;;  %v596_v2 = vsel %vm595_vm8, %v593_v25, %v1046_v29  ;;  %v597_v31 = vsel %vm595_vm8, %v594_v27, %v1052_v42 }
  0x92   : > { %v602_v63 = vsel %vm581_vm4, %v1093_v48, %v1102_v1  ;;  %v575_v8 = vrot.slane %v574_v38, 2  ;;  %v599_v13 = vsel %vm598_vm9, %v596_v2, %v1060_v56  ;;  %v600_v36 = vsel %vm598_vm9, %v597_v31, %v1065_v12 }
  0x93   : > { %v550_v33 = vadd.f32 %v549_v30, %v548_v58  ;;  %v569_v45 = vadd.f32 %v568_v50, %v567_v5  ;;  %v603_v61 = vsel %vm153_vm0, %v601_v28, %v1116_v35  ;;  %v604_v29 = vsel %vm153_vm0, %v602_v63, %v1120_v52  ;;  %615 = vst [vmem:[%s1176_s20] sm:$0xff] %v599_v13 }
  0x94   : > { %616 = vst [vmem:[%s1176_s20 + $0x8] sm:$0xff] %v600_v36  ;;  %v551_v42 = vmul.f32 0.25, %v543_v23  ;;  %v576_v49 = vadd.f32 %v575_v8, %v574_v38  ;;  %v605_v48 = vsel %vm586_vm5, %v603_v61, %v1128_v11  ;;  %v606_v56 = vsel %vm586_vm5, %v604_v29, %v1130_v20 }
  0x95   : > { %v552_v1 = vmul.f32 0.25, %v550_v33  ;;  %v570_v12 = vrot.slane %v569_v45, 1  ;;  %v607_v35 = vsel %vm589_vm6, %v605_v48, %v1136_v32  ;;  %v608_v7 = vsel %vm589_vm6, %v606_v56, %v496_v4 }
  0x96   : > { %v577_v52 = vrot.slane %v576_v49, 1  ;;  %v609_v41 = vsel %vm592_vm7, %v607_v35, %v523_v15  ;;  %v610_v19 = vsel %vm592_vm7, %v608_v7, %v524_v16 }
  0x97   : > { %v571_v43 = vadd.f32 %v570_v12, %v569_v45  ;;  %v611_v11 = vsel %vm595_vm8, %v609_v41, %v551_v42  ;;  %v612_v20 = vsel %vm595_vm8, %v610_v19, %v552_v1 }
  0x98   : > { %v578_v59 = vadd.f32 %v577_v52, %v576_v49 }
  0x99   : > { %v579_v44 = vmul.f32 0.25, %v571_v43 }
  0x9a   : > { %v580_v17 = vmul.f32 0.25, %v578_v59 }
  0x9b   : > { %v613_v24 = vsel %vm598_vm9, %v611_v11, %v579_v44 }
  0x9c   : > { %v614_v46 = vsel %vm598_vm9, %v612_v20, %v580_v17  ;;  %617 = vst [vmem:[%s1176_s20 + $0x10] sm:$0xff] %v613_v24 }
  0x9d   : > { %618 = vst [vmem:[%s1176_s20 + $0x18] sm:$0xff] %v614_v46 }
  0x9e PF: > { %p11_p8 = scmp.ge.s32.totalorder %s842_s11, 4   ;;  %s1233_s6 = smov %s797_s7 }
  0x9f   : > { %s1234_s7 = smov %s801_s8  ;;  %s1235_s8 = smov %s852_s14 }
  0xa0   : > { %s1236_s9 = smov %s842_s11  ;;  %13 = sbr.rel (!%p11_p8) target bundleno = 3 (0x3), region = 64 }
  0xa7   :  { %640 = vsyncpa [#allocation3], 1 }
  0xa8   :  { %642 = vsyncpa [#allocation3 + $0x1], 1 }

// kernel: inception_aux_forward.6
= control target key start
LH: loop header
LB: loop body
LE: loop exit
PB: predicated region body
PF: predicated region fallthrough
CT: control target
= control target key end

     0   :  { %s1589_s15 = smov 0   ;;  %s1591_s16 = smov 0   ;;  %s1910_s0 = inlined_call_operand.vmem [shape: bf16[8,2048], index: 0, kind: input, shape index: {}]   ;;  %s1911_s1 = inlined_call_operand.vmem [shape: bf16[2048,1024], index: 1, kind: input, shape index: {}]   ;;  %s1912_s2 = inlined_call_operand.vmem [shape: f32[1,1024], index: 2, kind: input, shape index: {}]   ;;  %s1913_s3 = inlined_call_operand.vmem [shape: f32[1,1024], index: 3, kind: input, shape index: {}]   ;;  %s1914_s4 = inlined_call_operand.vmem [shape: f32[8,1024], index: 4, kind: output, shape index: {}]  }
   0x1   :  { %s1593_s17 = smov 0   ;;  %s1595_s18 = smov 0  }
   0x2   :  { %s1597_s19 = smov 0   ;;  %s1599_s20 = smov 0  }
   0x3   :  { %s1601_s21 = smov 0  }
   0x4 LB: > { %s26_s22 = sadd.s32 1, %s1553_s19  ;;  %s29_s23 = sadd.s32 1, %s1557_s20  ;;  %s1561_s21 = sphi %s1601_s21, %s14_s21   ;;  %s1557_s20 = sphi %s1599_s20, %s1920_s20   ;;  %s1553_s19 = sphi %s1597_s19, %s1919_s19   ;;  %s1549_s18 = sphi %s1595_s18, %s1918_s18   ;;  %s1545_s17 = sphi %s1593_s17, %s1917_s17   ;;  %s1541_s16 = sphi %s1591_s16, %s1916_s16   ;;  %s1537_s15 = sphi %s1589_s15, %s1915_s15  }
   0x5   : > { %p27_p0 = scmp.ge.s32.totalorder %s26_s22, 4  ;;  %p77_p1 = scmp.ne.s32.totalorder %s1541_s16, %s1537_s15 }
   0x6   : > { %p78_p2 = scmp.eq.s32.totalorder %s1561_s21, 0  ;;  %s70_s27 = sadd.s32 1, %s1541_s16 }
   0x7   : > { %s1922_s22 = smov (%p27_p0, %s26_s22), 0  ;;  %s1924_s23 = smov (!%p27_p0, %s29_s23), %s1557_s20 }
   0x8   : > { %p79_p3 = por %p78_p2, %p77_p1  ;;  %p31_p4 = scmp.ge.s32.totalorder %s1924_s23, 4 }
   0x9   : > { %s65_s24 = ssub.s32 %s1553_s19, %s1922_s22  ;;  %p1263_p6 = scmp.ge.s32.totalorder %s1561_s21, 16 }
   0xa   : > { %s1926_s23 = smov (%p31_p4, %s1924_s23), 0 }
   0xb   : > { %s66_s25 = ssub.s32 %s1557_s20, %s1926_s23  ;;  %183 = sbr.rel (%p1263_p6) target bundleno = 89 (0x59), region = 16 }
   0xc   : > { %s67_s26 = sor.u32 %s66_s25, %s65_s24 }
   0xd   : > { %p68_p5 = scmp.eq.s32.totalorder %s67_s26, 0 }
   0xf   : > { %s1640_s28 = scalar_select %p68_p5, %s1541_s16, %s70_s27  }
  0x12   : > { %199 = sbr.rel (!%p79_p3) target bundleno = 89 (0x59), region = 24  ;;  %s201_s29 = sand.u32 (%p79_p3), 1, %s1541_s16  }
  0x13   : > { %s1266_s30 = sshll.u32 (%p79_p3), %s1557_s20, 1  ;;  %s1264_s5 = sshll.u32 (%p79_p3), %s201_s29, 9 }
  0x14   : > { %s1349_s6 = sshll.u32 (%p79_p3), %s1553_s19, 9  ;;  %s1654_s12 = scalar_lea.vmem (%p79_p3), [#allocation3], %s1264_s5 }
  0x15   : > { %s207_s7 = sadd.s32 (%p79_p3), %s1349_s6, %s1266_s30 }
  0x16   : > { %s1268_s8 = sshll.u32 (%p79_p3), %s207_s7, 2 }
  0x17   : > { %s1649_s11 = scalar_lea.vmem (%p79_p3), %s1911_s1, %s1268_s8 }
  0x18   : > { %v363_v0 = vld [vmem:[%s1649_s11] sm:$0xff] (%p79_p3) }
  0x19   : > { %v365_v1 = vld [vmem:[%s1649_s11 + $0x20] sm:$0xff]  ;;  %364 = vst [vmem:[%s1654_s12] sm:$0xff] %v363_v0 }
  0x1a   : > { %v367_v2 = vld [vmem:[%s1649_s11 + $0x40] sm:$0xff]  ;;  %366 = vst [vmem:[%s1654_s12 + $0x8] sm:$0xff] %v365_v1 }
  0x1b   : > { %368 = vst [vmem:[%s1654_s12 + $0x10] sm:$0xff] %v367_v2  ;;  %v369_v3 = vld [vmem:[%s1649_s11 + $0x60] sm:$0xff] }
  0x1c   : > { %v371_v4 = vld [vmem:[%s1649_s11 + $0x80] sm:$0xff]  ;;  %370 = vst [vmem:[%s1654_s12 + $0x18] sm:$0xff] %v369_v3 }
  0x1d   : > { %v373_v5 = vld [vmem:[%s1649_s11 + $0xa0] sm:$0xff]  ;;  %372 = vst [vmem:[%s1654_s12 + $0x20] sm:$0xff] %v371_v4 }
  0x1e   : > { %374 = vst [vmem:[%s1654_s12 + $0x28] sm:$0xff] %v373_v5  ;;  %v375_v6 = vld [vmem:[%s1649_s11 + $0xc0] sm:$0xff] }
  0x1f   : > { %v377_v7 = vld [vmem:[%s1649_s11 + $0xe0] sm:$0xff]  ;;  %376 = vst [vmem:[%s1654_s12 + $0x30] sm:$0xff] %v375_v6 }
  0x20   : > { %v379_v8 = vld [vmem:[%s1649_s11 + $0x100] sm:$0xff]  ;;  %378 = vst [vmem:[%s1654_s12 + $0x38] sm:$0xff] %v377_v7 }
  0x21   : > { %380 = vst [vmem:[%s1654_s12 + $0x40] sm:$0xff] %v379_v8  ;;  %v381_v9 = vld [vmem:[%s1649_s11 + $0x120] sm:$0xff] }
  0x22   : > { %v383_v10 = vld [vmem:[%s1649_s11 + $0x140] sm:$0xff]  ;;  %382 = vst [vmem:[%s1654_s12 + $0x48] sm:$0xff] %v381_v9 }
  0x23   : > { %v385_v11 = vld [vmem:[%s1649_s11 + $0x160] sm:$0xff]  ;;  %384 = vst [vmem:[%s1654_s12 + $0x50] sm:$0xff] %v383_v10 }
  0x24   : > { %386 = vst [vmem:[%s1654_s12 + $0x58] sm:$0xff] %v385_v11  ;;  %v387_v12 = vld [vmem:[%s1649_s11 + $0x180] sm:$0xff] }
  0x25   : > { %v389_v13 = vld [vmem:[%s1649_s11 + $0x1a0] sm:$0xff]  ;;  %388 = vst [vmem:[%s1654_s12 + $0x60] sm:$0xff] %v387_v12 }
  0x26   : > { %v391_v14 = vld [vmem:[%s1649_s11 + $0x1c0] sm:$0xff]  ;;  %390 = vst [vmem:[%s1654_s12 + $0x68] sm:$0xff] %v389_v13 }
  0x27   : > { %392 = vst [vmem:[%s1654_s12 + $0x70] sm:$0xff] %v391_v14  ;;  %v393_v15 = vld [vmem:[%s1649_s11 + $0x1e0] sm:$0xff] }
  0x28   : > { %v395_v16 = vld [vmem:[%s1649_s11 + $0x200] sm:$0xff]  ;;  %394 = vst [vmem:[%s1654_s12 + $0x78] sm:$0xff] %v393_v15 }
  0x29   : > { %v397_v17 = vld [vmem:[%s1649_s11 + $0x220] sm:$0xff]  ;;  %396 = vst [vmem:[%s1654_s12 + $0x80] sm:$0xff] %v395_v16 }
  0x2a   : > { %398 = vst [vmem:[%s1654_s12 + $0x88] sm:$0xff] %v397_v17  ;;  %v399_v18 = vld [vmem:[%s1649_s11 + $0x240] sm:$0xff] }
  0x2b   : > { %v401_v19 = vld [vmem:[%s1649_s11 + $0x260] sm:$0xff]  ;;  %400 = vst [vmem:[%s1654_s12 + $0x90] sm:$0xff] %v399_v18 }
  0x2c   : > { %v403_v20 = vld [vmem:[%s1649_s11 + $0x280] sm:$0xff]  ;;  %402 = vst [vmem:[%s1654_s12 + $0x98] sm:$0xff] %v401_v19 }
  0x2d   : > { %404 = vst [vmem:[%s1654_s12 + $0xa0] sm:$0xff] %v403_v20  ;;  %v405_v21 = vld [vmem:[%s1649_s11 + $0x2a0] sm:$0xff] }
  0x2e   : > { %v407_v22 = vld [vmem:[%s1649_s11 + $0x2c0] sm:$0xff]  ;;  %406 = vst [vmem:[%s1654_s12 + $0xa8] sm:$0xff] %v405_v21 }
  0x2f   : > { %v409_v23 = vld [vmem:[%s1649_s11 + $0x2e0] sm:$0xff]  ;;  %408 = vst [vmem:[%s1654_s12 + $0xb0] sm:$0xff] %v407_v22 }
  0x30   : > { %410 = vst [vmem:[%s1654_s12 + $0xb8] sm:$0xff] %v409_v23  ;;  %v411_v24 = vld [vmem:[%s1649_s11 + $0x300] sm:$0xff] }
  0x31   : > { %v413_v25 = vld [vmem:[%s1649_s11 + $0x320] sm:$0xff]  ;;  %412 = vst [vmem:[%s1654_s12 + $0xc0] sm:$0xff] %v411_v24 }
  0x32   : > { %v415_v26 = vld [vmem:[%s1649_s11 + $0x340] sm:$0xff]  ;;  %414 = vst [vmem:[%s1654_s12 + $0xc8] sm:$0xff] %v413_v25 }
  0x33   : > { %416 = vst [vmem:[%s1654_s12 + $0xd0] sm:$0xff] %v415_v26  ;;  %v417_v27 = vld [vmem:[%s1649_s11 + $0x360] sm:$0xff] }
  0x34   : > { %v419_v28 = vld [vmem:[%s1649_s11 + $0x380] sm:$0xff]  ;;  %418 = vst [vmem:[%s1654_s12 + $0xd8] sm:$0xff] %v417_v27 }
  0x35   : > { %v421_v29 = vld [vmem:[%s1649_s11 + $0x3a0] sm:$0xff]  ;;  %420 = vst [vmem:[%s1654_s12 + $0xe0] sm:$0xff] %v419_v28 }
  0x36   : > { %422 = vst [vmem:[%s1654_s12 + $0xe8] sm:$0xff] %v421_v29  ;;  %v423_v30 = vld [vmem:[%s1649_s11 + $0x3c0] sm:$0xff] }
  0x37   : > { %v425_v31 = vld [vmem:[%s1649_s11 + $0x3e0] sm:$0xff]  ;;  %424 = vst [vmem:[%s1654_s12 + $0xf0] sm:$0xff] %v423_v30 }
  0x38   : > { %v427_v32 = vld [vmem:[%s1649_s11 + $0x400] sm:$0xff]  ;;  %426 = vst [vmem:[%s1654_s12 + $0xf8] sm:$0xff] %v425_v31 }
  0x39   : > { %428 = vst [vmem:[%s1654_s12 + $0x100] sm:$0xff] %v427_v32  ;;  %v429_v33 = vld [vmem:[%s1649_s11 + $0x420] sm:$0xff] }
  0x3a   : > { %v431_v34 = vld [vmem:[%s1649_s11 + $0x440] sm:$0xff]  ;;  %430 = vst [vmem:[%s1654_s12 + $0x108] sm:$0xff] %v429_v33 }
  0x3b   : > { %v433_v35 = vld [vmem:[%s1649_s11 + $0x460] sm:$0xff]  ;;  %432 = vst [vmem:[%s1654_s12 + $0x110] sm:$0xff] %v431_v34 }
  0x3c   : > { %434 = vst [vmem:[%s1654_s12 + $0x118] sm:$0xff] %v433_v35  ;;  %v435_v36 = vld [vmem:[%s1649_s11 + $0x480] sm:$0xff] }
  0x3d   : > { %v437_v37 = vld [vmem:[%s1649_s11 + $0x4a0] sm:$0xff]  ;;  %436 = vst [vmem:[%s1654_s12 + $0x120] sm:$0xff] %v435_v36 }
  0x3e   : > { %v439_v38 = vld [vmem:[%s1649_s11 + $0x4c0] sm:$0xff]  ;;  %438 = vst [vmem:[%s1654_s12 + $0x128] sm:$0xff] %v437_v37 }
  0x3f   : > { %440 = vst [vmem:[%s1654_s12 + $0x130] sm:$0xff] %v439_v38  ;;  %v441_v39 = vld [vmem:[%s1649_s11 + $0x4e0] sm:$0xff] }
  0x40   : > { %v443_v40 = vld [vmem:[%s1649_s11 + $0x500] sm:$0xff]  ;;  %442 = vst [vmem:[%s1654_s12 + $0x138] sm:$0xff] %v441_v39 }
  0x41   : > { %v445_v41 = vld [vmem:[%s1649_s11 + $0x520] sm:$0xff]  ;;  %444 = vst [vmem:[%s1654_s12 + $0x140] sm:$0xff] %v443_v40 }
  0x42   : > { %446 = vst [vmem:[%s1654_s12 + $0x148] sm:$0xff] %v445_v41  ;;  %v447_v42 = vld [vmem:[%s1649_s11 + $0x540] sm:$0xff] }
  0x43   : > { %v449_v43 = vld [vmem:[%s1649_s11 + $0x560] sm:$0xff]  ;;  %448 = vst [vmem:[%s1654_s12 + $0x150] sm:$0xff] %v447_v42 }
  0x44   : > { %v451_v44 = vld [vmem:[%s1649_s11 + $0x580] sm:$0xff]  ;;  %450 = vst [vmem:[%s1654_s12 + $0x158] sm:$0xff] %v449_v43 }
  0x45   : > { %452 = vst [vmem:[%s1654_s12 + $0x160] sm:$0xff] %v451_v44  ;;  %v453_v45 = vld [vmem:[%s1649_s11 + $0x5a0] sm:$0xff] }
  0x46   : > { %v455_v46 = vld [vmem:[%s1649_s11 + $0x5c0] sm:$0xff]  ;;  %454 = vst [vmem:[%s1654_s12 + $0x168] sm:$0xff] %v453_v45 }
  0x47   : > { %v457_v47 = vld [vmem:[%s1649_s11 + $0x5e0] sm:$0xff]  ;;  %456 = vst [vmem:[%s1654_s12 + $0x170] sm:$0xff] %v455_v46 }
  0x48   : > { %458 = vst [vmem:[%s1654_s12 + $0x178] sm:$0xff] %v457_v47  ;;  %v459_v48 = vld [vmem:[%s1649_s11 + $0x600] sm:$0xff] }
  0x49   : > { %v461_v49 = vld [vmem:[%s1649_s11 + $0x620] sm:$0xff]  ;;  %460 = vst [vmem:[%s1654_s12 + $0x180] sm:$0xff] %v459_v48 }
  0x4a   : > { %v463_v50 = vld [vmem:[%s1649_s11 + $0x640] sm:$0xff]  ;;  %462 = vst [vmem:[%s1654_s12 + $0x188] sm:$0xff] %v461_v49 }
  0x4b   : > { %464 = vst [vmem:[%s1654_s12 + $0x190] sm:$0xff] %v463_v50  ;;  %v465_v51 = vld [vmem:[%s1649_s11 + $0x660] sm:$0xff] }
  0x4c   : > { %v467_v52 = vld [vmem:[%s1649_s11 + $0x680] sm:$0xff]  ;;  %466 = vst [vmem:[%s1654_s12 + $0x198] sm:$0xff] %v465_v51 }
  0x4d   : > { %v469_v53 = vld [vmem:[%s1649_s11 + $0x6a0] sm:$0xff]  ;;  %468 = vst [vmem:[%s1654_s12 + $0x1a0] sm:$0xff] %v467_v52 }
  0x4e   : > { %470 = vst [vmem:[%s1654_s12 + $0x1a8] sm:$0xff] %v469_v53  ;;  %v471_v54 = vld [vmem:[%s1649_s11 + $0x6c0] sm:$0xff] }
  0x4f   : > { %v473_v55 = vld [vmem:[%s1649_s11 + $0x6e0] sm:$0xff]  ;;  %472 = vst [vmem:[%s1654_s12 + $0x1b0] sm:$0xff] %v471_v54 }
  0x50   : > { %v475_v56 = vld [vmem:[%s1649_s11 + $0x700] sm:$0xff]  ;;  %474 = vst [vmem:[%s1654_s12 + $0x1b8] sm:$0xff] %v473_v55 }
  0x51   : > { %476 = vst [vmem:[%s1654_s12 + $0x1c0] sm:$0xff] %v475_v56  ;;  %v477_v57 = vld [vmem:[%s1649_s11 + $0x720] sm:$0xff] }
  0x52   : > { %v479_v58 = vld [vmem:[%s1649_s11 + $0x740] sm:$0xff]  ;;  %478 = vst [vmem:[%s1654_s12 + $0x1c8] sm:$0xff] %v477_v57 }
  0x53   : > { %v481_v59 = vld [vmem:[%s1649_s11 + $0x760] sm:$0xff]  ;;  %480 = vst [vmem:[%s1654_s12 + $0x1d0] sm:$0xff] %v479_v58 }
  0x54   : > { %482 = vst [vmem:[%s1654_s12 + $0x1d8] sm:$0xff] %v481_v59  ;;  %v483_v60 = vld [vmem:[%s1649_s11 + $0x780] sm:$0xff] }
  0x55   : > { %v485_v61 = vld [vmem:[%s1649_s11 + $0x7a0] sm:$0xff]  ;;  %484 = vst [vmem:[%s1654_s12 + $0x1e0] sm:$0xff] %v483_v60 }
  0x56   : > { %v487_v62 = vld [vmem:[%s1649_s11 + $0x7c0] sm:$0xff]  ;;  %486 = vst [vmem:[%s1654_s12 + $0x1e8] sm:$0xff] %v485_v61 }
  0x57   : > { %488 = vst [vmem:[%s1654_s12 + $0x1f0] sm:$0xff] %v487_v62  ;;  %v489_v63 = vld [vmem:[%s1649_s11 + $0x7e0] sm:$0xff] }
  0x58   : > { %490 = vst [vmem:[%s1654_s12 + $0x1f8] sm:$0xff] %v489_v63 }
  0x59 PF: > { %p1269_p7 = scmp.ge.s32.totalorder %s1561_s21, 1  ;;  %p511_p8 = scmp.lt.s32.totalorder %s1561_s21, 17 }
  0x5b   : > { %p512_p9 = pnand %p1269_p7, %p511_p8 }
  0x5c   : > { %s518_s13 = sand.u32 (!%p512_p9), 1, %s1537_s15   ;;  %s1271_s14 = sshll.u32 (!%p512_p9), %s1545_s17, 2 }
  0x5d   : > { %515 = sbr.rel (%p512_p9) target bundleno = 408 (0x198), region = 70  ;;  %s1270_s24 = sshll.u32 (!%p512_p9), %s518_s13, 9 }
  0x5e   : > { %p567_p10 = scmp.lt.s32.totalorder (!%p512_p9), %s1271_s14, 15  ;;  %s1273_s25 = sshll.u32 (!%p512_p9), %s1549_s18, 1 }
  0x5f   : > { %p577_p11 = scmp.lt.s32.totalorder (!%p512_p9), %s1273_s25, 7  ;;  %s1807_s13 = scalar_lea.vmem (!%p512_p9), [#allocation3], %s1270_s24 }
  0x60   : > { %p1277_p12 = scmp.ne.s32.totalorder (!%p512_p9), %s1545_s17, 0 }
  0x64   : > { %s1928_s14 = smov (!%p567_p10, %s1271_s14), 15  ;;  %s1930_s25 = smov (!%p577_p11, %s1273_s25), 7 }
  0x65   : > { %s1272_s26 = sshll.u32 %s1928_s14, 2  ;;  %s579_s15 = scalar_lea.vmem %s1912_s2, %s1930_s25  ;;  %v1563_v0 = vmov (!%p1277_p12), 0.0  }
  0x66   : > { %s1789_s30 = scalar_lea.vmem %s1910_s0, %s1272_s26  ;;  %s584_s18 = scalar_lea.vmem %s1913_s3, %s1930_s25  ;;  %600 = vst [vmem:[#allocation2] sm:$0xff] (!%p1277_p12), %v1563_v0  ;;  %601 = vst [vmem:[#allocation2 + $0x8] sm:$0xff] (!%p1277_p12), %v1563_v0 }
  0x67   : > { %s1276_s9 = sshll.u32 %s1930_s25, 3  ;;  %599 = sbr.rel (%p1277_p12) target bundleno = 110 (0x6e), region = 78 }
  0x68   : > { %s1805_s12 = scalar_lea.vmem %s1914_s4, %s1276_s9 }
  0x6e PF: > { %v1407_v1 = vld [vmem:[%s1807_s13 + $0x4] ss:$8 sps:$4 sm:$0xff]   ;;  %v1411_v3 = vld [vmem:[%s1807_s13] ss:$8 sps:$4 sm:$0xff]   ;;  %v1413_v5 = vld [vmem:[%s1807_s13 + $0x14] ss:$8 sps:$4 sm:$0xff]  }
  0x6f   : > { %v1409_v2 = vld [vmem:[%s1807_s13 + $0x104] ss:$8 sps:$4 sm:$0xff]   ;;  %1004 = vmatprep.subr.bf16.mxu0 %v1407_v1  ;;  %v1412_v4 = vld [vmem:[%s1807_s13 + $0x100] ss:$8 sps:$4 sm:$0xff]   ;;  %v1415_v6 = vld [vmem:[%s1807_s13 + $0x114] ss:$8 sps:$4 sm:$0xff]  }
  0x70   : > { %1045 = vmatprep.subr.bf16.mxu1 %v1409_v2  ;;  %1005 = vmatpush1.bf16.msra.mxu0 %v1411_v3  ;;  %v1417_v7 = vld [vmem:[%s1807_s13 + $0x10] ss:$8 sps:$4 sm:$0xff]   ;;  %v1419_v9 = vld [vmem:[%s1807_s13 + $0x24] ss:$8 sps:$4 sm:$0xff]   ;;  %v1423_v11 = vld [vmem:[%s1807_s13 + $0x20] ss:$8 sps:$4 sm:$0xff]  }
  0x71   : > { %1046 = vmatpush1.bf16.msra.mxu1 %v1412_v4  ;;  %1006 = vmatprep.subr.bf16.mxu0 %v1413_v5  ;;  %v1418_v8 = vld [vmem:[%s1807_s13 + $0x110] ss:$8 sps:$4 sm:$0xff]   ;;  %v1421_v10 = vld [vmem:[%s1807_s13 + $0x124] ss:$8 sps:$4 sm:$0xff]   ;;  %v1424_v12 = vld [vmem:[%s1807_s13 + $0x120] ss:$8 sps:$4 sm:$0xff]  }
  0x72   : > { %1047 = vmatprep.subr.bf16.mxu1 %v1415_v6  ;;  %v1425_v13 = vld [vmem:[%s1807_s13 + $0x34] ss:$8 sps:$4 sm:$0xff]   ;;  %v1429_v15 = vld [vmem:[%s1807_s13 + $0x30] ss:$8 sps:$4 sm:$0xff]   ;;  %v1431_v17 = vld [vmem:[%s1807_s13 + $0x44] ss:$8 sps:$4 sm:$0xff]  }
  0x73   : > { %v1427_v14 = vld [vmem:[%s1807_s13 + $0x134] ss:$8 sps:$4 sm:$0xff]   ;;  %v1430_v16 = vld [vmem:[%s1807_s13 + $0x130] ss:$8 sps:$4 sm:$0xff]   ;;  %v1433_v18 = vld [vmem:[%s1807_s13 + $0x144] ss:$8 sps:$4 sm:$0xff]  }
  0x74   : > { %1007 = vmatpush1.bf16.msra.mxu0 %v1417_v7  ;;  %v1435_v19 = vld [vmem:[%s1807_s13 + $0x40] ss:$8 sps:$4 sm:$0xff]   ;;  %v1437_v21 = vld [vmem:[%s1807_s13 + $0x54] ss:$8 sps:$4 sm:$0xff]   ;;  %v1441_v23 = vld [vmem:[%s1807_s13 + $0x50] ss:$8 sps:$4 sm:$0xff]  }
  0x75   : > { %1048 = vmatpush1.bf16.msra.mxu1 %v1418_v8  ;;  %1008 = vmatprep.subr.bf16.mxu0 %v1419_v9  ;;  %v1436_v20 = vld [vmem:[%s1807_s13 + $0x140] ss:$8 sps:$4 sm:$0xff]   ;;  %v1439_v22 = vld [vmem:[%s1807_s13 + $0x154] ss:$8 sps:$4 sm:$0xff]   ;;  %v1442_v24 = vld [vmem:[%s1807_s13 + $0x150] ss:$8 sps:$4 sm:$0xff]  }
  0x76   : > { %1049 = vmatprep.subr.bf16.mxu1 %v1421_v10  ;;  %v1443_v25 = vld [vmem:[%s1807_s13 + $0x64] ss:$8 sps:$4 sm:$0xff]   ;;  %v1447_v27 = vld [vmem:[%s1807_s13 + $0x60] ss:$8 sps:$4 sm:$0xff]   ;;  %v1449_v29 = vld [vmem:[%s1807_s13 + $0x74] ss:$8 sps:$4 sm:$0xff]  }
  0x77   : > { %v1445_v26 = vld [vmem:[%s1807_s13 + $0x164] ss:$8 sps:$4 sm:$0xff]   ;;  %v1448_v28 = vld [vmem:[%s1807_s13 + $0x160] ss:$8 sps:$4 sm:$0xff]   ;;  %v1451_v30 = vld [vmem:[%s1807_s13 + $0x174] ss:$8 sps:$4 sm:$0xff]  }
  0x78   : > { %1009 = vmatpush1.bf16.msra.mxu0 %v1423_v11  ;;  %v1453_v31 = vld [vmem:[%s1807_s13 + $0x70] ss:$8 sps:$4 sm:$0xff]   ;;  %v1455_v33 = vld [vmem:[%s1807_s13 + $0x84] ss:$8 sps:$4 sm:$0xff]   ;;  %v1459_v35 = vld [vmem:[%s1807_s13 + $0x80] ss:$8 sps:$4 sm:$0xff]  }
  0x79   : > { %1050 = vmatpush1.bf16.msra.mxu1 %v1424_v12  ;;  %1010 = vmatprep.subr.bf16.mxu0 %v1425_v13  ;;  %v1454_v32 = vld [vmem:[%s1807_s13 + $0x170] ss:$8 sps:$4 sm:$0xff]   ;;  %v1457_v34 = vld [vmem:[%s1807_s13 + $0x184] ss:$8 sps:$4 sm:$0xff]   ;;  %v1460_v36 = vld [vmem:[%s1807_s13 + $0x180] ss:$8 sps:$4 sm:$0xff]  }
  0x7a   : > { %1051 = vmatprep.subr.bf16.mxu1 %v1427_v14  ;;  %v1461_v37 = vld [vmem:[%s1807_s13 + $0x94] ss:$8 sps:$4 sm:$0xff]   ;;  %v1465_v39 = vld [vmem:[%s1807_s13 + $0x90] ss:$8 sps:$4 sm:$0xff]   ;;  %v1467_v41 = vld [vmem:[%s1807_s13 + $0xa4] ss:$8 sps:$4 sm:$0xff]  }
  0x7b   : > { %v1463_v38 = vld [vmem:[%s1807_s13 + $0x194] ss:$8 sps:$4 sm:$0xff]   ;;  %v1466_v40 = vld [vmem:[%s1807_s13 + $0x190] ss:$8 sps:$4 sm:$0xff]   ;;  %v1469_v42 = vld [vmem:[%s1807_s13 + $0x1a4] ss:$8 sps:$4 sm:$0xff]  }
  0x7c   : > { %1011 = vmatpush1.bf16.msra.mxu0 %v1429_v15  ;;  %v1471_v43 = vld [vmem:[%s1807_s13 + $0xa0] ss:$8 sps:$4 sm:$0xff]   ;;  %v1473_v45 = vld [vmem:[%s1807_s13 + $0xb4] ss:$8 sps:$4 sm:$0xff]   ;;  %v1477_v50 = vld [vmem:[%s1807_s13 + $0xb0] ss:$8 sps:$4 sm:$0xff]  }
  0x7d   : > { %1052 = vmatpush1.bf16.msra.mxu1 %v1430_v16  ;;  %1012 = vmatprep.subr.bf16.mxu0 %v1431_v17  ;;  %v1472_v44 = vld [vmem:[%s1807_s13 + $0x1a0] ss:$8 sps:$4 sm:$0xff]   ;;  %v1475_v46 = vld [vmem:[%s1807_s13 + $0x1b4] ss:$8 sps:$4 sm:$0xff]   ;;  %v1478_v51 = vld [vmem:[%s1807_s13 + $0x1b0] ss:$8 sps:$4 sm:$0xff]  }
  0x7e   : > { %1053 = vmatprep.subr.bf16.mxu1 %v1433_v18  ;;  %v604_v47 = vld [vmem:[%s1789_s30] sm:$0xff]  ;;  %v605_v49 = vld [vmem:[%s1789_s30 + $0x8] sm:$0xff]  ;;  %v1479_v53 = vld [vmem:[%s1807_s13 + $0xc4] ss:$8 sps:$4 sm:$0xff]   ;;  %p1346_p13 = scmp.ne.s32.totalorder %s1545_s17, 3 }
  0x7f   : > { %v1279_v48 = vcombine.high %v604_v47, %v604_v47  ;;  %v1281_v52 = vcombine.high %v605_v49, %v605_v49  ;;  %v1481_v54 = vld [vmem:[%s1807_s13 + $0x1c4] ss:$8 sps:$4 sm:$0xff]   ;;  %v1483_v55 = vld [vmem:[%s1807_s13 + $0xc0] ss:$8 sps:$4 sm:$0xff]   ;;  %v1485_v57 = vld [vmem:[%s1807_s13 + $0xd4] ss:$8 sps:$4 sm:$0xff]   ;;  %v1278_v5 = vcombine.low %v604_v47, %v604_v47  ;;  %v1280_v6 = vcombine.low %v605_v49, %v605_v49 }
  0x80   : > { %1013 = vmatpush1.bf16.msra.mxu0 %v1435_v19  ;;  %v1484_v56 = vld [vmem:[%s1807_s13 + $0x1c0] ss:$8 sps:$4 sm:$0xff]   ;;  %v1487_v58 = vld [vmem:[%s1807_s13 + $0x1d4] ss:$8 sps:$4 sm:$0xff]   ;;  %v1489_v59 = vld [vmem:[%s1807_s13 + $0xd0] ss:$8 sps:$4 sm:$0xff]  }
  0x81   : > { %1054 = vmatpush1.bf16.msra.mxu1 %v1436_v20  ;;  %1014 = vmatprep.subr.bf16.mxu0 %v1437_v21  ;;  %v1490_v60 = vld [vmem:[%s1807_s13 + $0x1d0] ss:$8 sps:$4 sm:$0xff]   ;;  %v1491_v61 = vld [vmem:[%s1807_s13 + $0xe4] ss:$8 sps:$4 sm:$0xff]   ;;  %v1495_v63 = vld [vmem:[%s1807_s13 + $0xe0] ss:$8 sps:$4 sm:$0xff]   ;;  %v1098_v21 = vlaneseq (!%p1346_p13) }
  0x82   : > { %1055 = vmatprep.subr.bf16.mxu1 %v1439_v22  ;;  %1036 = vmatprep.mubr.bf16.mxu0 %v1279_v48  ;;  %v1493_v62 = vld [vmem:[%s1807_s13 + $0x1e4] ss:$8 sps:$4 sm:$0xff]   ;;  %v1496_v0 = vld [vmem:[%s1807_s13 + $0x1e0] ss:$8 sps:$4 sm:$0xff]   ;;  %v1497_v1 = vld [vmem:[%s1807_s13 + $0xf4] ss:$8 sps:$4 sm:$0xff]  }
  0x83   : > { %1077 = vmatprep.mubr.bf16.mxu1 %v1281_v52  ;;  %v1499_v2 = vld [vmem:[%s1807_s13 + $0x1f4] ss:$8 sps:$4 sm:$0xff]   ;;  %v1501_v3 = vld [vmem:[%s1807_s13 + $0xf0] ss:$8 sps:$4 sm:$0xff]   ;;  %v1099_v22 = vshrl.u32 (!%p1346_p13), %v1098_v21, 7 }
  0x84   : > { %1015 = vmatpush1.bf16.msra.mxu0 %v1441_v23  ;;  %v1502_v4 = vld [vmem:[%s1807_s13 + $0x1f0] ss:$8 sps:$4 sm:$0xff]  }
  0x85   : > { %1056 = vmatpush1.bf16.msra.mxu1 %v1442_v24  ;;  %1016 = vmatprep.subr.bf16.mxu0 %v1443_v25  ;;  %v602_v8 = vld [vmem:[#allocation2] sm:$0xff]  ;;  %v603_v12 = vld [vmem:[#allocation2 + $0x8] sm:$0xff]  ;;  %v1100_v25 = vsub.s32 (!%p1346_p13), 0, %v1099_v22 }
  0x86   : > { %1057 = vmatprep.subr.bf16.mxu1 %v1445_v26  ;;  %v1096_v23 = vld [vmem:[%s579_s15] sm:$0x3] (!%p1346_p13)  ;;  %v1104_v26 = vsub.s32 (!%p1346_p13), 1, %v1099_v22 }
  0x87   : > { %v1110_v24 = vld [vmem:[%s584_s18] sm:$0x3] (!%p1346_p13) }
  0x88   : > { %1017 = vmatpush1.bf16.msra.mxu0 %v1447_v27 }
  0x89   : > { %1058 = vmatpush1.bf16.msra.mxu1 %v1448_v28  ;;  %1018 = vmatprep.subr.bf16.mxu0 %v1449_v29  ;;  %v1101_v29 = vrot.slane (!%p1346_p13), %v1096_v23, %v1100_v25 }
  0x8a   : > { %1059 = vmatprep.subr.bf16.mxu1 %v1451_v30  ;;  %v1115_v30 = vrot.slane (!%p1346_p13), %v1110_v24, %v1100_v25 }
  0x8c   : > { %1019 = vmatpush1.bf16.msra.mxu0 %v1453_v31  ;;  %v1105_v31 = vrot.slane (!%p1346_p13), %v1096_v23, %v1104_v26 }
  0x8d   : > { %1060 = vmatpush1.bf16.msra.mxu1 %v1454_v32  ;;  %1020 = vmatprep.subr.bf16.mxu0 %v1455_v33  ;;  %v1119_v32 = vrot.slane (!%p1346_p13), %v1110_v24, %v1104_v26 }
  0x8e   : > { %1061 = vmatprep.subr.bf16.mxu1 %v1457_v34 }
  0x90   : > { %1021 = vmatpush1.bf16.msra.mxu0 %v1459_v35 }
  0x91   : > { %1062 = vmatpush1.bf16.msra.mxu1 %v1460_v36  ;;  %1022 = vmatprep.subr.bf16.mxu0 %v1461_v37 }
  0x92   : > { %1063 = vmatprep.subr.bf16.mxu1 %v1463_v38 }
  0x94   : > { %1023 = vmatpush1.bf16.msra.mxu0 %v1465_v39 }
  0x95   : > { %1064 = vmatpush1.bf16.msra.mxu1 %v1466_v40  ;;  %1024 = vmatprep.subr.bf16.mxu0 %v1467_v41 }
  0x96   : > { %1065 = vmatprep.subr.bf16.mxu1 %v1469_v42 }
  0x98   : > { %1025 = vmatpush1.bf16.msra.mxu0 %v1471_v43 }
  0x99   : > { %1066 = vmatpush1.bf16.msra.mxu1 %v1472_v44  ;;  %1026 = vmatprep.subr.bf16.mxu0 %v1473_v45 }
  0x9a   : > { %1067 = vmatprep.subr.bf16.mxu1 %v1475_v46 }
  0x9c   : > { %1027 = vmatpush1.bf16.msra.mxu0 %v1477_v50 }
  0x9d   : > { %1068 = vmatpush1.bf16.msra.mxu1 %v1478_v51  ;;  %1028 = vmatprep.subr.bf16.mxu0 %v1479_v53 }
  0x9e   : > { %1069 = vmatprep.subr.bf16.mxu1 %v1481_v54 }
  0xa0   : > { %1029 = vmatpush1.bf16.msra.mxu0 %v1483_v55 }
  0xa1   : > { %1070 = vmatpush1.bf16.msra.mxu1 %v1484_v56  ;;  %1030 = vmatprep.subr.bf16.mxu0 %v1485_v57 }
  0xa2   : > { %1071 = vmatprep.subr.bf16.mxu1 %v1487_v58 }
  0xa4   : > { %1031 = vmatpush1.bf16.msra.mxu0 %v1489_v59 }
  0xa5   : > { %1072 = vmatpush1.bf16.msra.mxu1 %v1490_v60  ;;  %1032 = vmatprep.subr.bf16.mxu0 %v1491_v61 }
  0xa6   : > { %1073 = vmatprep.subr.bf16.mxu1 %v1493_v62 }
  0xa8   : > { %1033 = vmatpush1.bf16.msra.mxu0 %v1495_v63 }
  0xa9   : > { %1074 = vmatpush1.bf16.msra.mxu1 %v1496_v0  ;;  %1034 = vmatprep.subr.bf16.mxu0 %v1497_v1 }
  0xaa   : > { %1075 = vmatprep.subr.bf16.mxu1 %v1499_v2 }
  0xac   : > { %1035 = vmatpush1.bf16.msra.mxu0 %v1501_v3 }
  0xad   : > { %1076 = vmatpush1.bf16.msra.mxu1 %v1502_v4 }
  0xaf   : > { %1037 = vmatmul.mubr.bf16.vlgmr.msra.gmra.mrb[0].mxu0 %v1278_v5 }
  0xb0   : > { %1078 = vmatmul.mubr.bf16.vlgmr.msra.gmra.mrb[0].mxu1 %v1280_v6 }
 0x182   : > { %v1038_v7 = vpop.f32.mrb[0].mxu0 }
 0x183   : > { %v1079_v9 = vpop.f32.mrb[0].mxu1  ;;  %v1040_v11 = vpop.f32.mrb[1].mxu0  ;;  %1093 = sbr.rel (%p1346_p13) target bundleno = 408 (0x198), region = 82 }
 0x184   : > { %v1080_v10 = vadd.f32 %v1079_v9, %v1038_v7  ;;  %v1081_v13 = vpop.f32.mrb[1].mxu1  ;;  %v1042_v15 = vpop.f32.mrb[2].mxu0 }
 0x185   : > { %v1082_v14 = vadd.f32 %v1081_v13, %v1040_v11  ;;  %v1083_v16 = vpop.f32.mrb[2].mxu1  ;;  %v1043_v18 = vpop.f32.mrb[3].mxu0 }
 0x186   : > { %v1086_v17 = vadd.f32 %v1080_v10, %v602_v8  ;;  %v1084_v19 = vpop.f32.mrb[3].mxu1 }
 0x187   : > { %v1087_v20 = vadd.f32 %v1082_v14, %v603_v12 }
 0x188   : > { %1088 = vst [vmem:[#allocation2] sm:$0xff] %v1086_v17 }
 0x189   : > { %1089 = vst [vmem:[#allocation2 + $0x8] sm:$0xff] %v1087_v20 }
 0x18f   : > { %v1094_v27 = vld [vmem:[#allocation2] sm:$0xff] }
 0x190   : > { %v1095_v28 = vld [vmem:[#allocation2 + $0x8] sm:$0xff]  ;;  %v1108_v33 = vmul.f32 %v1101_v29, %v1094_v27 }
 0x191   : > { %v1109_v34 = vmul.f32 %v1105_v31, %v1095_v28 }
 0x192   : > { %v1122_v35 = vadd.f32 %v1115_v30, %v1108_v33 }
 0x193   : > { %v1123_v36 = vadd.f32 %v1119_v32, %v1109_v34 }
 0x194   : > { %v1124_v37 = vmax.f32 %v1122_v35, 0.0 }
 0x195   : > { %v1125_v38 = vmax.f32 %v1123_v36, 0.0 }
 0x196   : > { %1126 = vst [vmem:[%s1805_s12] sm:$0xff] %v1124_v37 }
 0x197   : > { %1127 = vst [vmem:[%s1805_s12 + $0x8] sm:$0xff] %v1125_v38 }
 0x198 PF: > { %s14_s21 = sadd.s32 1, %s1561_s21   ;;  %s1915_s15 = smov %s1541_s16 }
 0x199   : > { %p11_p0 = scmp.ge.s32.totalorder %s14_s21, 18   ;;  %s1916_s16 = smov %s1640_s28 }
 0x19a   : > { %s1917_s17 = smov %s1553_s19  ;;  %s1918_s18 = smov %s1557_s20 }
 0x19b   : > { %s1919_s19 = smov %s1922_s22  ;;  %s1920_s20 = smov %s1926_s23 }
 0x19c   :  { %13 = sbr.rel (!%p11_p0) target bundleno = 4 (0x4), region = 126 }

// kernel: inception_aux_forward.7
= control target key start
LH: loop header
LB: loop body
LE: loop exit
PB: predicated region body
PF: predicated region fallthrough
CT: control target
= control target key end

     0   :  { %s1008_s15 = smov 0   ;;  %s1010_s16 = smov 0   ;;  %s1094_s0 = inlined_call_operand.vmem [shape: bf16[8,1024], index: 0, kind: input, shape index: {}]   ;;  %s1095_s1 = inlined_call_operand.vmem [shape: bf16[1024,128], index: 1, kind: input, shape index: {}]   ;;  %s1096_s2 = inlined_call_operand.vmem [shape: f32[1,128], index: 2, kind: input, shape index: {}]   ;;  %s1097_s3 = inlined_call_operand.vmem [shape: f32[1,128], index: 3, kind: input, shape index: {}]   ;;  %s1098_s4 = inlined_call_operand.vmem [shape: f32[8,128], index: 4, kind: output, shape index: {}]  }
   0x1   :  { %s1012_s17 = smov 0  }
   0x2 LB: > { %s26_s18 = sadd.s32 1, %s976_s16  ;;  %p805_p0 = scmp.ge.s32.totalorder %s980_s17, 1  ;;  %s980_s17 = sphi %s1012_s17, %s14_s17   ;;  %s976_s16 = sphi %s1010_s16, %s1100_s16   ;;  %s972_s15 = sphi %s1008_s15, %s1099_s15  }
   0x3   : > { %p27_p1 = scmp.ge.s32.totalorder %s26_s18, 2  ;;  %p222_p2 = scmp.lt.s32.totalorder %s980_s17, 3 }
   0x5   : > { %s1102_s18 = smov (%p27_p1, %s26_s18), 0  ;;  %p223_p3 = pnand %p805_p0, %p222_p2 }
   0x6   : > { %s806_s19 = sshll.u32 (!%p223_p3), %s972_s15, 2  ;;  %s808_s20 = sshll.u32 (!%p223_p3), %s972_s15, 6 }
   0x7   : > { %226 = sbr.rel (%p223_p3) target bundleno = 291 (0x123), region = 36  ;;  %p271_p4 = scmp.lt.s32.totalorder (!%p223_p3), %s806_s19, 7 }
   0x8   : > { %p279_p5 = scmp.lt.s32.totalorder (!%p223_p3), %s808_s20, 127  ;;  %p810_p6 = scmp.ne.s32.totalorder (!%p223_p3), %s972_s15, 0 }
   0xe   : > { %s1104_s19 = smov (!%p271_p4, %s806_s19), 7  ;;  %s1106_s20 = smov (!%p279_p5, %s808_s20), 127 }
   0xf   : > { %s807_s21 = sshll.u32 %s1104_s19, 2  ;;  %s809_s25 = sshll.u32 %s1106_s20, 2  ;;  %v982_v0 = vmov (!%p810_p6), 0.0  }
  0x10   : > { %s1033_s24 = scalar_lea.vmem %s1094_s0, %s807_s21  ;;  %s1038_s28 = scalar_lea.vmem %s1095_s1, %s809_s25  ;;  %305 = vst [vmem:[#allocation2] sm:$0xff] (!%p810_p6), %v982_v0 }
  0x11   : > { %304 = sbr.rel (%p810_p6) target bundleno = 24 (0x18), region = 40 }
  0x18 PF: > { %v922_v1 = vld [vmem:[%s1038_s28 + $0x40] sm:$0xff]   ;;  %v926_v5 = vld [vmem:[%s1038_s28 + $0x48] sm:$0xff]   ;;  %v930_v9 = vld [vmem:[%s1038_s28 + $0x50] sm:$0xff]   ;;  %p847_p7 = scmp.ne.s32.totalorder %s972_s15, 1 }
  0x19   : > { %v923_v2 = vld [vmem:[%s1038_s28 + $0xc0] sm:$0xff]   ;;  %853 = vmatprep.subr.bf16.mxu0 %v922_v1  ;;  %v927_v6 = vld [vmem:[%s1038_s28 + $0xc8] sm:$0xff]   ;;  %v931_v10 = vld [vmem:[%s1038_s28 + $0xd0] sm:$0xff]  }
  0x1a   : > { %v924_v3 = vld [vmem:[%s1038_s28] sm:$0xff]   ;;  %875 = vmatprep.subr.bf16.mxu1 %v923_v2  ;;  %v928_v7 = vld [vmem:[%s1038_s28 + $0x8] sm:$0xff]   ;;  %v932_v11 = vld [vmem:[%s1038_s28 + $0x10] sm:$0xff]  }
  0x1b   : > { %v925_v4 = vld [vmem:[%s1038_s28 + $0x80] sm:$0xff]   ;;  %854 = vmatpush3.bf16.msra.mxu0 %v924_v3  ;;  %v929_v8 = vld [vmem:[%s1038_s28 + $0x88] sm:$0xff]   ;;  %v933_v12 = vld [vmem:[%s1038_s28 + $0x90] sm:$0xff]  }
  0x1c   : > { %876 = vmatpush3.bf16.msra.mxu1 %v925_v4  ;;  %855 = vmatprep.subr.bf16.mxu0 %v926_v5  ;;  %v934_v13 = vld [vmem:[%s1038_s28 + $0x58] sm:$0xff]   ;;  %v938_v17 = vld [vmem:[%s1038_s28 + $0x60] sm:$0xff]   ;;  %v942_v21 = vld [vmem:[%s1038_s28 + $0x68] sm:$0xff]  }
  0x1d   : > { %877 = vmatprep.subr.bf16.mxu1 %v927_v6  ;;  %v935_v14 = vld [vmem:[%s1038_s28 + $0xd8] sm:$0xff]   ;;  %v939_v18 = vld [vmem:[%s1038_s28 + $0xe0] sm:$0xff]   ;;  %v943_v22 = vld [vmem:[%s1038_s28 + $0xe8] sm:$0xff]  }
  0x1e   : > { %v936_v15 = vld [vmem:[%s1038_s28 + $0x18] sm:$0xff]   ;;  %v940_v19 = vld [vmem:[%s1038_s28 + $0x20] sm:$0xff]   ;;  %v944_v23 = vld [vmem:[%s1038_s28 + $0x28] sm:$0xff]  }
  0x1f   : > { %856 = vmatpush3.bf16.msra.mxu0 %v928_v7  ;;  %v937_v16 = vld [vmem:[%s1038_s28 + $0x98] sm:$0xff]   ;;  %v941_v20 = vld [vmem:[%s1038_s28 + $0xa0] sm:$0xff]   ;;  %v945_v24 = vld [vmem:[%s1038_s28 + $0xa8] sm:$0xff]  }
  0x20   : > { %878 = vmatpush3.bf16.msra.mxu1 %v929_v8  ;;  %857 = vmatprep.subr.bf16.mxu0 %v930_v9  ;;  %v946_v25 = vld [vmem:[%s1038_s28 + $0x70] sm:$0xff]   ;;  %v950_v29 = vld [vmem:[%s1038_s28 + $0x78] sm:$0xff]   ;;  %v307_v33 = vld [vmem:[%s1033_s24] sm:$0xff] }
  0x21   : > { %879 = vmatprep.subr.bf16.mxu1 %v931_v10  ;;  %v947_v26 = vld [vmem:[%s1038_s28 + $0xf0] sm:$0xff]   ;;  %v951_v30 = vld [vmem:[%s1038_s28 + $0xf8] sm:$0xff]   ;;  %v308_v34 = vld [vmem:[%s1033_s24 + $0x8] sm:$0xff]  ;;  %v811_v35 = vcombine.low %v307_v33, %v307_v33  ;;  %v812_v36 = vcombine.high %v307_v33, %v307_v33 }
  0x22   : > { %v948_v27 = vld [vmem:[%s1038_s28 + $0x30] sm:$0xff]   ;;  %v952_v31 = vld [vmem:[%s1038_s28 + $0x38] sm:$0xff]   ;;  %v813_v37 = vcombine.low %v308_v34, %v308_v34  ;;  %v814_v38 = vcombine.high %v308_v34, %v308_v34  ;;  %v306_v47 = vld [vmem:[#allocation2] sm:$0xff] }
  0x23   : > { %858 = vmatpush3.bf16.msra.mxu0 %v932_v11  ;;  %v949_v28 = vld [vmem:[%s1038_s28 + $0xb0] sm:$0xff]   ;;  %v953_v32 = vld [vmem:[%s1038_s28 + $0xb8] sm:$0xff]   ;;  %611 = vmatprep.mubr.bf16.mxu0 %v812_v36  ;;  %v848_v53 = vld [vmem:[%s1096_s2] ss:$0 sm:$0xff] (!%p847_p7) }
  0x24   : > { %880 = vmatpush3.bf16.msra.mxu1 %v933_v12  ;;  %859 = vmatprep.subr.bf16.mxu0 %v934_v13  ;;  %v849_v54 = vld [vmem:[%s1097_s3] ss:$0 sm:$0xff] (!%p847_p7) }
  0x25   : > { %881 = vmatprep.subr.bf16.mxu1 %v935_v14  ;;  %651 = vmatprep.mubr.bf16.mxu1 %v814_v38 }
  0x27   : > { %860 = vmatpush3.bf16.msra.mxu0 %v936_v15 }
  0x28   : > { %882 = vmatpush3.bf16.msra.mxu1 %v937_v16  ;;  %861 = vmatprep.subr.bf16.mxu0 %v938_v17 }
  0x29   : > { %883 = vmatprep.subr.bf16.mxu1 %v939_v18 }
  0x2b   : > { %862 = vmatpush3.bf16.msra.mxu0 %v940_v19 }
  0x2c   : > { %884 = vmatpush3.bf16.msra.mxu1 %v941_v20  ;;  %863 = vmatprep.subr.bf16.mxu0 %v942_v21 }
  0x2d   : > { %885 = vmatprep.subr.bf16.mxu1 %v943_v22 }
  0x2f   : > { %864 = vmatpush3.bf16.msra.mxu0 %v944_v23 }
  0x30   : > { %886 = vmatpush3.bf16.msra.mxu1 %v945_v24  ;;  %865 = vmatprep.subr.bf16.mxu0 %v946_v25 }
  0x31   : > { %887 = vmatprep.subr.bf16.mxu1 %v947_v26 }
  0x33   : > { %866 = vmatpush3.bf16.msra.mxu0 %v948_v27 }
  0x34   : > { %888 = vmatpush3.bf16.msra.mxu1 %v949_v28  ;;  %867 = vmatprep.subr.bf16.mxu0 %v950_v29 }
  0x35   : > { %889 = vmatprep.subr.bf16.mxu1 %v951_v30 }
  0x37   : > { %868 = vmatpush3.bf16.msra.mxu0 %v952_v31 }
  0x38   : > { %890 = vmatpush3.bf16.msra.mxu1 %v953_v32 }
  0x3a   : > { %612 = vmatmul.mubr.bf16.vlgmr.msra.gmra.mrb[0].mxu0 %v811_v35 }
  0x3b   : > { %652 = vmatmul.mubr.bf16.vlgmr.msra.gmra.mrb[0].mxu1 %v813_v37 }
 0x10d   : > { %v869_v39 = vpop.f32.mrb[0].mxu0 }
 0x10e   : > { %v891_v40 = vpop.f32.mrb[0].mxu1  ;;  %v870_v41 = vpop.f32.mrb[1].mxu0 }
 0x10f   : > { %v892_v42 = vpop.f32.mrb[1].mxu1  ;;  %v871_v43 = vadd.f32 %v870_v41, %v869_v39  ;;  %v872_v45 = vpop.f32.mrb[2].mxu0 }
 0x110   : > { %v893_v44 = vadd.f32 %v892_v42, %v891_v40  ;;  %v894_v46 = vpop.f32.mrb[2].mxu1  ;;  %v873_v48 = vpop.f32.mrb[3].mxu0  ;;  %664 = sbr.rel (%p847_p7) target bundleno = 291 (0x123), region = 44 }
 0x111   : > { %v895_v49 = vpop.f32.mrb[3].mxu1 }
 0x112   : > { %v654_v50 = vadd.f32 %v893_v44, %v871_v43 }
 0x114   : > { %v659_v51 = vadd.f32 %v654_v50, %v306_v47 }
 0x116   : > { %660 = vst [vmem:[#allocation2] sm:$0xff] %v659_v51 }
 0x11d   : > { %v665_v52 = vld [vmem:[#allocation2] sm:$0xff] }
 0x11e   : > { %v673_v55 = vmul.f32 %v848_v53, %v665_v52 }
 0x120   : > { %v681_v56 = vadd.f32 %v849_v54, %v673_v55 }
 0x122   : > { %682 = vst [vmem:[%s1098_s4] sm:$0xff] %v681_v56 }
 0x123 PF: > { %s14_s17 = sadd.s32 1, %s980_s17   ;;  %s1099_s15 = smov %s976_s16 }
 0x124   : > { %p11_p8 = scmp.ge.s32.totalorder %s14_s17, 4   ;;  %s1100_s16 = smov %s1102_s18 }
 0x126   :  { %13 = sbr.rel (!%p11_p8) target bundleno = 2 (0x2), region = 83 }

</bundles_post_ra>
